<compile_context>
chip_gen: v7x
topology: tpu7x:2x2x1
jax: 0.10.0
libtpu: 0.0.40
codegen_flags: <defaults>
</compile_context>

<pallas_src>
import jax
import jax.numpy as jnp
from jax.experimental import pallas as pl
from jax.experimental.pallas import tpu as pltpu


def _round_up(x, m):
    return ((x + m - 1) // m) * m


def _vmem_budget_bytes():
    """Physical-VMEM-aware budget (v7x has only 64 MiB per TensorCore)."""
    try:
        phys = pltpu.get_tpu_info().vmem_capacity_bytes
    except Exception:
        phys = 64 << 20  # assume the smallest (v7x per-TC) if the query is unavailable
    return max(min(phys - (12 << 20), 100 << 20), 32 << 20)


def _make_kernel(TH, W, Cin):
    K = 9 * Cin

    def kernel(x_ref, w_ref, scale_ref, bias_ref, o_ref):
        # x_ref:     (1, TH+2, W+2, Cin)  haloed, zero-padded input rows for this tile
        # w_ref:     (9*Cin, TN)          conv weights, rows ordered (kh, kw, cin)
        # scale_ref: (1, TN)              folded BN scale = gamma / sqrt(var + eps)
        # bias_ref:  (1, TN)              folded BN bias  = beta - mean * scale
        # o_ref:     (1, TH*W, TN)
        xb = x_ref[0]
        # In-kernel im2col: nine shifted VMEM views -> (TH*W, 9*Cin) patch matrix.
        taps = [xb[kh:kh + TH, kw:kw + W, :] for kh in range(3) for kw in range(3)]
        patches = jnp.concatenate(taps, axis=-1).reshape(TH * W, K)
        acc = jnp.dot(patches, w_ref[...], preferred_element_type=jnp.float32)
        y = acc * scale_ref[...] + bias_ref[...]               # fused BN (eval mode)
        o_ref[0] = jnp.maximum(y, 0.0).astype(o_ref.dtype)     # fused ReLU

    return kernel


def _choose_tiles(H, W, Cin, Cout_pad, in_bytes, budget, max_tile_rows):
    # One j step whenever possible so the weight matrix is streamed exactly once.
    if Cout_pad <= 512:
        TN = Cout_pad
    else:
        TN = max(t for t in (512, 256, 128) if Cout_pad % t == 0)
    K = 9 * Cin

    def est_vmem(th):
        m = th * W
        x_blk = 2 * (th + 2) * _round_up(W + 2, 8) * _round_up(Cin, 128) * in_bytes
        w_blk = 2 * _round_up(K, 8) * _round_up(TN, 128) * in_bytes
        patches = _round_up(m, 8) * _round_up(K, 128) * in_bytes
        o_blk = 2 * _round_up(m, 8) * _round_up(TN, 128) * 4
        return x_blk + w_blk + patches + o_blk + (4 << 20)

    th = H if max_tile_rows is None else max(1, min(H, int(max_tile_rows)))
    while th > 1 and est_vmem(th) > budget:
        th -= 1
    # TODO(synk): for very wide layers (Cin >= ~1024 f32) add a K ("arbitrary") grid axis
    # with an f32 VMEM accumulator instead of shrinking TH all the way down.
    return th, TN


def conv_layer_forward(x_nchw, w_oihw, gamma, beta, run_mean, run_var,
                       eps=1e-5, compute_dtype=None, max_tile_rows=None):
    """ConvLayer forward: Conv2d(3x3, s=1, same-pad, no bias) -> BatchNorm2d(eval) -> ReLU.

    Patch assembly (im2col) happens inside the kernel from a haloed row tile, so the
    activation tensor crosses HBM once instead of 9x. `compute_dtype=jnp.bfloat16`
    enables the bf16 MXU fast path on v6e/v7x (f32 accumulation either way).
    """
    N, Cin, H, W = x_nchw.shape
    Cout = w_oihw.shape[0]
    out_dtype = x_nchw.dtype
    op_dtype = jnp.dtype(compute_dtype) if compute_dtype is not None else jnp.dtype(out_dtype)

    Cout_pad = _round_up(Cout, 128)
    budget = _vmem_budget_bytes()
    TH, TN = _choose_tiles(H, W, Cin, Cout_pad, op_dtype.itemsize, budget, max_tile_rows)
    num_h_tiles = (H + TH - 1) // TH
    H_pad = num_h_tiles * TH
    P = N * num_h_tiles
    K = 9 * Cin

    # ---- minimal wrapper glue: layout + zero pad only (no im2col materialization) ----
    x_nhwc = jnp.transpose(x_nchw, (0, 2, 3, 1))                       # NCHW -> NHWC
    x_padded = jnp.pad(x_nhwc, ((0, 0), (1, 1 + H_pad - H), (1, 1), (0, 0)))
    if num_h_tiles == 1:
        x_tiles = x_padded                                             # (N, H+2, W+2, Cin)
    else:
        # haloed row tiles: tile t needs padded rows [t*TH, t*TH + TH + 2)
        row_idx = jnp.arange(num_h_tiles)[:, None] * TH + jnp.arange(TH + 2)[None, :]
        x_tiles = x_padded[:, row_idx].reshape(P, TH + 2, W + 2, Cin)
    x_tiles = x_tiles.astype(op_dtype)

    # OIHW -> (kh, kw, cin, cout) -> (9*Cin, Cout_pad); row order matches in-kernel tap order.
    w_mat = jnp.transpose(w_oihw, (2, 3, 1, 0)).reshape(K, Cout)
    w_mat = jnp.pad(w_mat, ((0, 0), (0, Cout_pad - Cout))).astype(op_dtype)

    # Eval-mode BN folded into per-channel scale/bias (kept f32 for the epilogue).
    scale = (gamma / jnp.sqrt(run_var + eps)).astype(jnp.float32)
    bias = (beta - run_mean * scale).astype(jnp.float32)
    scale2d = jnp.pad(scale.reshape(1, Cout), ((0, 0), (0, Cout_pad - Cout)))
    bias2d = jnp.pad(bias.reshape(1, Cout), ((0, 0), (0, Cout_pad - Cout)))

    grid = (P, Cout_pad // TN)
    kernel = _make_kernel(TH, W, Cin)

    out = pl.pallas_call(
        kernel,
        out_shape=jax.ShapeDtypeStruct((P, TH * W, Cout_pad), out_dtype),
        grid_spec=pltpu.PrefetchScalarGridSpec(
            num_scalar_prefetch=0,
            grid=grid,
            in_specs=[
                pl.BlockSpec((1, TH + 2, W + 2, Cin), lambda p, j: (p, 0, 0, 0)),
                pl.BlockSpec((K, TN), lambda p, j: (0, j)),
                pl.BlockSpec((1, TN), lambda p, j: (0, j)),
                pl.BlockSpec((1, TN), lambda p, j: (0, j)),
            ],
            out_specs=pl.BlockSpec((1, TH * W, TN), lambda p, j: (p, 0, j)),
        ),
        compiler_params=pltpu.CompilerParams(
            dimension_semantics=("parallel", "parallel"),
            vmem_limit_bytes=int(budget),
        ),
    )(x_tiles, w_mat, scale2d, bias2d)

    # strip padding, restore NCHW (module contract)
    out = out.reshape(N, H_pad, W, Cout_pad)[:, :H, :, :Cout]
    # TODO(synk): keep activations NHWC end-to-end (and emit NHWC here) when the surrounding
    # network allows, to drop the two layout transposes from the HBM path.
    return jnp.transpose(out, (0, 3, 1, 2))


def _reference(x_nchw, w_oihw, gamma, beta, run_mean, run_var, eps=1e-5):
    y = jax.lax.conv_general_dilated(
        x_nchw, w_oihw, window_strides=(1, 1), padding=((1, 1), (1, 1)),
        dimension_numbers=("NCHW", "OIHW", "NCHW"))
    scale = (gamma / jnp.sqrt(run_var + eps)).reshape(1, -1, 1, 1)
    bias = (beta - run_mean * gamma / jnp.sqrt(run_var + eps)).reshape(1, -1, 1, 1)
    return jnp.maximum(y * scale + bias, 0.0)


if __name__ == "__main__":
    key = jax.random.PRNGKey(0)
    k_x, k_w, k_g, k_b, k_m, k_v = jax.random.split(key, 6)

    N, Cin, Cout, H, W = 2, 4, 8, 16, 16

    x = jax.random.normal(k_x, (N, Cin, H, W), dtype=jnp.float32)
    # Conv2d weight (out_channels, in_channels, 3, 3); use_bias=False in the module.
    w = jax.random.normal(k_w, (Cout, Cin, 3, 3), dtype=jnp.float32) * 0.1
    # BatchNorm2d parameters (eval-mode semantics with running statistics).
    gamma = 1.0 + 0.1 * jax.random.normal(k_g, (Cout,), dtype=jnp.float32)
    beta = 0.1 * jax.random.normal(k_b, (Cout,), dtype=jnp.float32)
    run_mean = 0.1 * jax.random.normal(k_m, (Cout,), dtype=jnp.float32)
    run_var = jnp.abs(1.0 + 0.1 * jax.random.normal(k_v, (Cout,), dtype=jnp.float32))

    ref = _reference(x, w, gamma, beta, run_mean, run_var)

    # Whole-image tiles (TH == H): no halo duplication, no gather.
    out = jax.block_until_ready(conv_layer_forward(x, w, gamma, beta, run_mean, run_var))
    assert out.shape == (N, Cout, H, W)
    assert jnp.allclose(out, ref, atol=1e-4, rtol=1e-4)

    # Row-tiled path with a 2-row halo (exercises the general big-image tiling).
    out_tiled = jax.block_until_ready(
        conv_layer_forward(x, w, gamma, beta, run_mean, run_var, max_tile_rows=8))
    assert jnp.allclose(out_tiled, ref, atol=1e-4, rtol=1e-4)

    print("KERNEL_OK")
</pallas_src>

<mosaic_0001>
module attributes {stable_mosaic.version = 11 : i64} {
  func.func @kernel(%arg0: i32, %arg1: i32, %arg2: memref<1x18x18x4xf32, #tpu.memory_space<vmem>>, %arg3: memref<36x128xf32, #tpu.memory_space<vmem>>, %arg4: memref<1x128xf32, #tpu.memory_space<vmem>>, %arg5: memref<1x128xf32, #tpu.memory_space<vmem>>, %arg6: memref<1x256x128xf32, #tpu.memory_space<vmem>>) attributes {dimension_semantics = [#tpu.dimension_semantics<parallel>, #tpu.dimension_semantics<parallel>], iteration_bounds = array<i64: 2, 1>, scalar_prefetch = 0 : i64, scratch_operands = 0 : i64, tpu.core_type = #tpu.core_type<tc>, window_params = [{transform_indices = @transform_0, window_bounds = array<i64: 1, 18, 18, 4>}, {transform_indices = @transform_1, window_bounds = array<i64: 36, 128>}, {transform_indices = @transform_2, window_bounds = array<i64: 1, 128>}, {transform_indices = @transform_3, window_bounds = array<i64: 1, 128>}, {transform_indices = @transform_4, window_bounds = array<i64: 1, 256, 128>}]} {
    %c0 = arith.constant 0 : index
    %c0_0 = arith.constant 0 : index
    %c0_1 = arith.constant 0 : index
    %c0_2 = arith.constant 0 : index
    %0 = vector.load %arg2[%c0, %c0_0, %c0_1, %c0_2] : memref<1x18x18x4xf32, #tpu.memory_space<vmem>>, vector<1x18x18x4xf32>
    %1 = vector.shape_cast %0 : vector<1x18x18x4xf32> to vector<18x18x4xf32>
    %2 = vector.extract_strided_slice %1 {offsets = [0, 0, 0], sizes = [16, 16, 4], strides = [1, 1, 1]} : vector<18x18x4xf32> to vector<16x16x4xf32>
    %3 = vector.extract_strided_slice %1 {offsets = [0, 1, 0], sizes = [16, 16, 4], strides = [1, 1, 1]} : vector<18x18x4xf32> to vector<16x16x4xf32>
    %4 = vector.extract_strided_slice %1 {offsets = [0, 2, 0], sizes = [16, 16, 4], strides = [1, 1, 1]} : vector<18x18x4xf32> to vector<16x16x4xf32>
    %5 = vector.extract_strided_slice %1 {offsets = [1, 0, 0], sizes = [16, 16, 4], strides = [1, 1, 1]} : vector<18x18x4xf32> to vector<16x16x4xf32>
    %6 = vector.extract_strided_slice %1 {offsets = [1, 1, 0], sizes = [16, 16, 4], strides = [1, 1, 1]} : vector<18x18x4xf32> to vector<16x16x4xf32>
    %7 = vector.extract_strided_slice %1 {offsets = [1, 2, 0], sizes = [16, 16, 4], strides = [1, 1, 1]} : vector<18x18x4xf32> to vector<16x16x4xf32>
    %8 = vector.extract_strided_slice %1 {offsets = [2, 0, 0], sizes = [16, 16, 4], strides = [1, 1, 1]} : vector<18x18x4xf32> to vector<16x16x4xf32>
    %9 = vector.extract_strided_slice %1 {offsets = [2, 1, 0], sizes = [16, 16, 4], strides = [1, 1, 1]} : vector<18x18x4xf32> to vector<16x16x4xf32>
    %10 = vector.extract_strided_slice %1 {offsets = [2, 2, 0], sizes = [16, 16, 4], strides = [1, 1, 1]} : vector<18x18x4xf32> to vector<16x16x4xf32>
    %11 = tpu.concatenate %2, %3, %4, %5, %6, %7, %8, %9, %10 in 2 : vector<16x16x4xf32>, vector<16x16x4xf32>, vector<16x16x4xf32>, vector<16x16x4xf32>, vector<16x16x4xf32>, vector<16x16x4xf32>, vector<16x16x4xf32>, vector<16x16x4xf32>, vector<16x16x4xf32> -> vector<16x16x36xf32>
    %12 = vector.shape_cast %11 : vector<16x16x36xf32> to vector<256x36xf32>
    %c0_3 = arith.constant 0 : index
    %c0_4 = arith.constant 0 : index
    %13 = vector.load %arg3[%c0_3, %c0_4] : memref<36x128xf32, #tpu.memory_space<vmem>>, vector<36x128xf32>
    %cst = arith.constant dense<0.000000e+00> : vector<256x128xf32>
    %14 = tpu.matmul %12, %13, %cst {dimension_numbers = #tpu.dot_dimension_numbers<[1], [0], [0], [1], [0, 0, 1, 1], [], []>} : vector<256x36xf32>, vector<36x128xf32>, vector<256x128xf32> -> vector<256x128xf32>
    %c0_5 = arith.constant 0 : index
    %c0_6 = arith.constant 0 : index
    %15 = vector.load %arg4[%c0_5, %c0_6] : memref<1x128xf32, #tpu.memory_space<vmem>>, vector<1x128xf32>
    %16 = vector.broadcast %15 : vector<1x128xf32> to vector<256x128xf32>
    %17 = arith.mulf %14, %16 : vector<256x128xf32>
    %c0_7 = arith.constant 0 : index
    %c0_8 = arith.constant 0 : index
    %18 = vector.load %arg5[%c0_7, %c0_8] : memref<1x128xf32, #tpu.memory_space<vmem>>, vector<1x128xf32>
    %19 = vector.broadcast %18 : vector<1x128xf32> to vector<256x128xf32>
    %20 = arith.addf %17, %19 : vector<256x128xf32>
    %cst_9 = arith.constant 0.000000e+00 : f32
    %21 = vector.broadcast %cst_9 : f32 to vector<256x128xf32>
    %22 = arith.maximumf %20, %21 : vector<256x128xf32>
    %c0_10 = arith.constant 0 : index
    %c0_11 = arith.constant 0 : index
    %c0_12 = arith.constant 0 : index
    %23 = vector.load %arg6[%c0_10, %c0_11, %c0_12] : memref<1x256x128xf32, #tpu.memory_space<vmem>>, vector<1x256x128xf32>
    %24 = vector.shape_cast %23 : vector<1x256x128xf32> to vector<256x128xf32>
    %25 = vector.shape_cast %22 : vector<256x128xf32> to vector<1x256x128xf32>
    tpu.vector_store %arg6[%c0_10, %c0_11, %c0_12], %25 {strides = array<i32>} : memref<1x256x128xf32, #tpu.memory_space<vmem>>, vector<1x256x128xf32>,
    return
  }
  func.func @transform_0(%arg0: i32, %arg1: i32) -> (i32, i32, i32, i32) {
    %c0_i32 = arith.constant 0 : i32
    %c0_i32_0 = arith.constant 0 : i32
    %c0_i32_1 = arith.constant 0 : i32
    %c0_i32_2 = arith.constant 0 : i32
    return %arg0, %c0_i32, %c0_i32_0, %c0_i32_1 : i32, i32, i32, i32
  }
  func.func @transform_1(%arg0: i32, %arg1: i32) -> (i32, i32) {
    %c0_i32 = arith.constant 0 : i32
    %c0_i32_0 = arith.constant 0 : i32
    return %c0_i32, %arg1 : i32, i32
  }
  func.func @transform_2(%arg0: i32, %arg1: i32) -> (i32, i32) {
    %c0_i32 = arith.constant 0 : i32
    %c0_i32_0 = arith.constant 0 : i32
    return %c0_i32, %arg1 : i32, i32
  }
  func.func @transform_3(%arg0: i32, %arg1: i32) -> (i32, i32) {
    %c0_i32 = arith.constant 0 : i32
    %c0_i32_0 = arith.constant 0 : i32
    return %c0_i32, %arg1 : i32, i32
  }
  func.func @transform_4(%arg0: i32, %arg1: i32) -> (i32, i32, i32) {
    %c0_i32 = arith.constant 0 : i32
    %c0_i32_0 = arith.constant 0 : i32
    return %arg0, %c0_i32, %arg1 : i32, i32, i32
  }
}

</mosaic_0001>

<bundles_post_ra>
// kernel: tpu_custom_call.1
= control target key start
LH: loop header
LB: loop body
LE: loop exit
PB: predicated region body
PF: predicated region fallthrough
CT: control target
= control target key end

     0   :  { %9 = vsyncpa [#allocation3], 0  ;;  %s4439_s0 = inlined_call_operand.vmem [shape: f32[2,18,18,4], index: 0, kind: input, shape index: {}]   ;;  %s4440_s1 = inlined_call_operand.vmem [shape: f32[36,128], index: 1, kind: input, shape index: {}]   ;;  %s4441_s2 = inlined_call_operand.vmem [shape: f32[1,128], index: 2, kind: input, shape index: {}]   ;;  %s4442_s3 = inlined_call_operand.vmem [shape: f32[1,128], index: 3, kind: input, shape index: {}]   ;;  %s4443_s4 = inlined_call_operand.hbm [shape: f32[2,256,128], index: 4, kind: output, shape index: {}]  }
   0x1   :  { %11 = vsyncpa [#allocation3 + $0x1], 0  ;;  %s2534_s15 = smov 0   ;;  %s2536_s16 = smov 0  }
   0x2   :  { %s2538_s17 = smov 0   ;;  %s2540_s18 = smov 0  }
   0x3   :  { %s2542_s19 = smov 0   ;;  %s2544_s20 = smov 0  }
   0x4 LB: > { %s2176_s21 = sadd.s32 4294967295, %s2497_s20   ;;  %s2177_s22 = sadd.s32 4294967294, %s2497_s20   ;;  %s2497_s20 = sphi %s2544_s20, %s17_s20   ;;  %s2493_s19 = sphi %s2542_s19, %s4690_s19   ;;  %s2489_s18 = sphi %s2540_s18, %s4689_s18   ;;  %s2485_s17 = sphi %s2538_s17, %s4688_s17   ;;  %s2481_s16 = sphi %s2536_s16, %s4687_s16   ;;  %s2477_s15 = sphi %s2534_s15, %s4686_s15  }
   0x5   : > { %s29_s23 = sadd.s32 1, %s2493_s19  ;;  %s142_s24 = sadd.s32 1, %s2485_s17 }
   0x6   : > { %p31_p0 = scmp.ge.s32.totalorder %s29_s23, 2  ;;  %p152_p1 = scmp.ne.s32.totalorder %s2485_s17, %s2481_s16 }
   0x7   : > { %p153_p2 = scmp.eq.s32.totalorder %s2176_s21, 1  ;;  %p158_p3 = scmp.ne.s32.totalorder %s2481_s16, %s2477_s15 }
   0x8   : > { %s4692_s23 = smov (%p31_p0, %s29_s23), 0  ;;  %p159_p5 = scmp.eq.s32.totalorder %s2177_s22, 1 }
   0x9   : > { %p2574_p4 = por %p153_p2, %p152_p1  ;;  %s137_s26 = ssub.s32 %s2493_s19, %s4692_s23 }
   0xa   : > { %p2183_p6 = scmp.ge.s32.totalorder %s2497_s20, 1  ;;  %p140_p7 = scmp.eq.s32.totalorder %s137_s26, 0 }
   0xb   : > { %p2581_p8 = por %p159_p5, %p158_p3  ;;  %p204_p9 = scmp.lt.s32.totalorder %s2497_s20, 3 }
   0xc   : > { %s2587_s28 = scalar_select %p140_p7, %s2485_s17, %s142_s24  }
   0xd   : > { %p205_p10 = pnand %p2183_p6, %p204_p9 }
   0xf   : > { %208 = sbr.rel (%p205_p10) target bundleno = 892 (0x37c), region = 36 }
  0x16   : > { %p240_p11 = scmp.lt.s32.totalorder %s2489_s18, 1  ;;  %vm357_vm0 = vcmask 1046528   ;;  %s2499_s8 = smov 4   ;;  %vm534_vm1 = vcmask 1045504   ;;  %vm1313_vm2 = vcmask 31744   ;;  %vm1346_vm3 = vcmask 64512  }
  0x17   : > { %s2500_s9 = smov 8   ;;  %s2501_s10 = smov 12   ;;  %vm1679_vm4 = vcmask 1043456   ;;  %vm1379_vm5 = vcmask 97280   ;;  %vm1412_vm6 = vcmask 130048   ;;  %vm1445_vm7 = vcmask 162816  }
  0x18   : > { %s241_s29 = scalar_select %p240_p11, %s2489_s18, 1  ;;  %vm1478_vm8 = vcmask 195584   ;;  %vm1511_vm9 = vcmask 228352   ;;  %vm1544_vm10 = vcmask 261120   ;;  %vm1582_vm11 = vcmask 293888  }
  0x19   : > { %s2502_s11 = smov 16   ;;  %s2503_s12 = smov 20  }
  0x1a   : > { %s2336_s30 = smul.u32 432, %s241_s29  ;;  %s2504_s13 = smov 24  }
  0x1b   : > { %s2505_s26 = smov 28   ;;  %s2506_s14 = smov 32  }
  0x1c   : > { %s2594_s7 = scalar_lea.vmem %s4439_s0, %s2336_s30 }
  0x1d   : > { %v2597_v0 = vld [vmem:[%s2594_s7 + $0x18] sm:$0xff]  ;;  %v2600_v1 = vld [vmem:[%s2594_s7 + $0x20] sm:$0xff]  ;;  %v2608_v5 = vld [vmem:[%s2594_s7 + $0x8] sm:$0xff] }
  0x1e   : > { %v2603_v2 = vld [vmem:[%s2594_s7] sm:$0xff]  ;;  %v363_v3 = vrot.slane %v2597_v0, 1  ;;  %v364_v4 = vrot.slane %v2600_v1, 1  ;;  %v2612_v7 = vld [vmem:[%s2594_s7 + $0x28] sm:$0x3]  ;;  %v359_v8 = vrot.slane %v2608_v5, 1 }
  0x1f   : > { %v358_v6 = vrot.slane %v2603_v2, 1  ;;  %v366_v9 = vrot.slane %v2612_v7, 1  ;;  %v2617_v10 = vld [vmem:[%s2594_s7 + $0x10] sm:$0x3]  ;;  %v2620_v11 = vld [vmem:[%s2594_s7 + $0x38] sm:$0xff]  ;;  %v2650_v24 = vld [vmem:[%s2594_s7 + $0x48] sm:$0xff] }
  0x20   : > { %v2623_v12 = vsel %vm357_vm0, %v363_v3, %v364_v4  ;;  %v361_v13 = vrot.slane %v2617_v10, 1  ;;  %v2627_v14 = vld [vmem:[%s2594_s7 + $0x40] sm:$0x3]  ;;  %v2630_v15 = vld [vmem:[%s2594_s7 + $0x30] sm:$0xff]  ;;  %v369_v18 = vrot.slane %v2620_v11, 1  ;;  %v373_v29 = vrot.slane %v2650_v24, 1 }
  0x21   : > { %442 = vrot.lane.b32.xlu1 %v2623_v12, %s2499_s8  ;;  %v360_v16 = vsel %vm357_vm0, %v358_v6, %v359_v8  ;;  %v2637_v17 = vsel %vm357_vm0, %v364_v4, %v366_v9  ;;  %v371_v19 = vrot.slane %v2627_v14, 1  ;;  %v368_v21 = vrot.slane %v2630_v15, 1  ;;  %v2644_v22 = vld [vmem:[%s2594_s7 + $0x50] sm:$0xff]  ;;  %v2647_v23 = vld [vmem:[%s2594_s7 + $0x58] sm:$0x3]  ;;  %v2665_v30 = vld [vmem:[%s2594_s7 + $0x68] sm:$0xff] }
  0x22   : > { %438 = vrot.lane.b32.xlu0 %v360_v16, %s2499_s8  ;;  %v362_v20 = vsel %vm357_vm0, %v359_v8, %v361_v13  ;;  %v374_v26 = vrot.slane %v2644_v22, 1  ;;  %v376_v27 = vrot.slane %v2647_v23, 1  ;;  %v2668_v31 = vld [vmem:[%s2594_s7 + $0x70] sm:$0x3]  ;;  %v2671_v32 = vld [vmem:[%s2594_s7 + $0x60] sm:$0xff]  ;;  %v379_v34 = vrot.slane %v2665_v30, 1 }
  0x23   : > { %v2656_v25 = vsel %vm357_vm0, %v369_v18, %v371_v19  ;;  %v2661_v28 = vsel %vm357_vm0, %v368_v21, %v369_v18  ;;  %v381_v35 = vrot.slane %v2668_v31, 1  ;;  %v378_v37 = vrot.slane %v2671_v32, 1  ;;  %v2687_v38 = vld [vmem:[%s2594_s7 + $0x80] sm:$0xff]  ;;  %v2690_v39 = vld [vmem:[%s2594_s7 + $0x88] sm:$0x3]  ;;  %v2693_v40 = vld [vmem:[%s2594_s7 + $0x78] sm:$0xff] }
  0x24   : > { %v2678_v33 = vsel %vm357_vm0, %v374_v26, %v376_v27  ;;  %v2683_v36 = vsel %vm357_vm0, %v373_v29, %v374_v26  ;;  %v384_v42 = vrot.slane %v2687_v38, 1  ;;  %v386_v43 = vrot.slane %v2690_v39, 1  ;;  %v2709_v46 = vld [vmem:[%s2594_s7 + $0x98] sm:$0xff]  ;;  %v2712_v47 = vld [vmem:[%s2594_s7 + $0xa0] sm:$0x3]  ;;  %v2715_v48 = vld [vmem:[%s2594_s7 + $0x90] sm:$0xff] }
  0x25   : > { %444 = vrot.lane.b32.xlu1 %v2637_v17, %s2499_s8  ;;  %4546 = vst [vmem:[#allocation5_spill] sm:$0xff] %v2678_v33  ;;  %4547 = vst [vmem:[#allocation6_spill] sm:$0xff] %v2683_v36  ;;  %v2700_v41 = vsel %vm357_vm0, %v379_v34, %v381_v35  ;;  %v2705_v44 = vsel %vm357_vm0, %v378_v37, %v379_v34  ;;  %v383_v45 = vrot.slane %v2693_v40, 1  ;;  %v389_v50 = vrot.slane %v2709_v46, 1  ;;  %v2731_v54 = vld [vmem:[%s2594_s7 + $0xb0] sm:$0xff]  ;;  %v2737_v56 = vld [vmem:[%s2594_s7 + $0xa8] sm:$0xff] }
  0x26   : > { %440 = vrot.lane.b32.xlu0 %v362_v20, %s2499_s8  ;;  %4548 = vst [vmem:[#allocation7_spill] sm:$0xff] %v2700_v41  ;;  %4549 = vst [vmem:[#allocation8_spill] sm:$0xff] %v2705_v44  ;;  %v2722_v49 = vsel %vm357_vm0, %v384_v42, %v386_v43  ;;  %v391_v51 = vrot.slane %v2712_v47, 1  ;;  %v388_v53 = vrot.slane %v2715_v48, 1  ;;  %v2734_v55 = vld [vmem:[%s2594_s7 + $0xb8] sm:$0x3] }
  0x27   : > { %4550 = vst [vmem:[#allocation9_spill] sm:$0xff] %v2722_v49  ;;  %v2727_v52 = vsel %vm357_vm0, %v383_v45, %v384_v42  ;;  %v394_v58 = vrot.slane %v2731_v54, 1  ;;  %v396_v59 = vrot.slane %v2734_v55, 1  ;;  %v393_v61 = vrot.slane %v2737_v56, 1  ;;  %v2753_v62 = vld [vmem:[%s2594_s7 + $0xc8] sm:$0xff]  ;;  %v2759_v3 = vld [vmem:[%s2594_s7 + $0xc0] sm:$0xff] }
  0x28   : > { %4551 = vst [vmem:[#allocation10_spill] sm:$0xff] %v2727_v52  ;;  %v2744_v57 = vsel %vm357_vm0, %v389_v50, %v391_v51  ;;  %v2749_v60 = vsel %vm357_vm0, %v388_v53, %v389_v50  ;;  %v2756_v63 = vld [vmem:[%s2594_s7 + $0xd0] sm:$0x3]  ;;  %v399_v6 = vrot.slane %v2753_v62, 1  ;;  %v398_v13 = vrot.slane %v2759_v3, 1  ;;  %v2775_v16 = vld [vmem:[%s2594_s7 + $0xe0] sm:$0xff] }
  0x29   : > { %448 = vrot.lane.b32.xlu1 %v2656_v25, %s2499_s8  ;;  %4552 = vst [vmem:[#allocation11_spill] sm:$0xff] %v2744_v57  ;;  %4553 = vst [vmem:[#allocation12_spill] sm:$0xff] %v2749_v60  ;;  %v2766_v4 = vsel %vm357_vm0, %v394_v58, %v396_v59  ;;  %v401_v8 = vrot.slane %v2756_v63, 1  ;;  %v2771_v9 = vsel %vm357_vm0, %v393_v61, %v394_v58  ;;  %v2778_v18 = vld [vmem:[%s2594_s7 + $0xe8] sm:$0x3]  ;;  %v2781_v19 = vld [vmem:[%s2594_s7 + $0xd8] sm:$0xff] }
  0x2a   : > { %446 = vrot.lane.b32.xlu0 %v2661_v28, %s2499_s8  ;;  %4554 = vst [vmem:[#allocation13_spill] sm:$0xff] %v2766_v4  ;;  %4555 = vst [vmem:[#allocation14_spill] sm:$0xff] %v2771_v9  ;;  %v404_v21 = vrot.slane %v2775_v16, 1  ;;  %v406_v26 = vrot.slane %v2778_v18, 1  ;;  %v2793_v27 = vsel %vm357_vm0, %v398_v13, %v399_v6  ;;  %v403_v29 = vrot.slane %v2781_v19, 1  ;;  %v2797_v34 = vld [vmem:[%s2594_s7 + $0xf8] sm:$0xff] }
  0x2b   : > { %v2788_v20 = vsel %vm357_vm0, %v399_v6, %v401_v8  ;;  %4557 = vst [vmem:[#allocation16_spill] sm:$0xff] %v2793_v27  ;;  %v2800_v35 = vld [vmem:[%s2594_s7 + $0x100] sm:$0x3]  ;;  %v2803_v37 = vld [vmem:[%s2594_s7 + $0xf0] sm:$0xff]  ;;  %v409_v43 = vrot.slane %v2797_v34, 1  ;;  %v2825_v59 = vld [vmem:[%s2594_s7 + $0x108] sm:$0xff] }
  0x2c   : > { %4556 = vst [vmem:[#allocation15_spill] sm:$0xff] %v2788_v20  ;;  %v2810_v42 = vsel %vm357_vm0, %v404_v21, %v406_v26  ;;  %v411_v45 = vrot.slane %v2800_v35, 1  ;;  %v2815_v50 = vsel %vm357_vm0, %v403_v29, %v404_v21  ;;  %v408_v51 = vrot.slane %v2803_v37, 1  ;;  %v2819_v53 = vld [vmem:[%s2594_s7 + $0x110] sm:$0xff]  ;;  %v2822_v58 = vld [vmem:[%s2594_s7 + $0x118] sm:$0x3] }
  0x2d   : > { %452 = vrot.lane.b32.xlu1 %v2678_v33, %s2499_s8  ;;  %4558 = vst [vmem:[#allocation17_spill] sm:$0xff] %v2815_v50  ;;  %v414_v6 = vrot.slane %v2819_v53, 1  ;;  %v416_v8 = vrot.slane %v2822_v58, 1  ;;  %v413_v21 = vrot.slane %v2825_v59, 1  ;;  %v2841_v26 = vld [vmem:[%s2594_s7 + $0x128] sm:$0xff]  ;;  %v2891_v33 = vld [vmem:[%s2594_s7 + $0x150] sm:$0xff] }
  0x2e   : > { %450 = vrot.lane.b32.xlu0 %v2683_v36, %s2499_s8  ;;  %v2832_v61 = vsel %vm357_vm0, %v409_v43, %v411_v45  ;;  %v2837_v13 = vsel %vm357_vm0, %v408_v51, %v409_v43  ;;  %v2844_v29 = vld [vmem:[%s2594_s7 + $0x130] sm:$0x3]  ;;  %v419_v43 = vrot.slane %v2841_v26, 1  ;;  %v428_v36 = vrot.slane %v2891_v33, 1 }
  0x2f   : > { %4559 = vst [vmem:[#allocation18_spill] sm:$0xff] %v2832_v61  ;;  %4560 = vst [vmem:[#allocation19_spill] sm:$0xff] %v2837_v13  ;;  %v2854_v45 = vsel %vm357_vm0, %v414_v6, %v416_v8  ;;  %v421_v51 = vrot.slane %v2844_v29, 1 }
  0x30   : > { %4561 = vst [vmem:[#allocation20_spill] sm:$0xff] %v2854_v45 }
  0x31   : > { %456 = vrot.lane.b32.xlu1 %v2700_v41, %s2499_s8  ;;  %v2876_v8 = vsel %vm357_vm0, %v419_v43, %v421_v51  ;;  %v2885_v41 = vld [vmem:[%s2594_s7 + $0x158] sm:$0xff] }
  0x32   : > { %454 = vrot.lane.b32.xlu0 %v2705_v44, %s2499_s8  ;;  %4563 = vst [vmem:[#allocation22_spill] sm:$0xff] %v2876_v8  ;;  %v2888_v44 = vld [vmem:[%s2594_s7 + $0x160] sm:$0x3] }
  0x35   : > { %460 = vrot.lane.b32.xlu1 %v2722_v49, %s2499_s8 }
  0x36   : > { %458 = vrot.lane.b32.xlu0 %v2727_v52, %s2499_s8 }
  0x39   : > { %464 = vrot.lane.b32.xlu1 %v2744_v57, %s2499_s8  ;;  %v2866_v57 = vld [vmem:[%s2594_s7 + $0x148] sm:$0x3] }
  0x3a   : > { %462 = vrot.lane.b32.xlu0 %v2749_v60, %s2499_s8  ;;  %v2869_v60 = vld [vmem:[%s2594_s7 + $0x138] sm:$0xff] }
  0x3b   : > { %v423_v52 = vrot.slane %v2869_v60, 1 }
  0x3d   : > { %468 = vrot.lane.b32.xlu1 %v2766_v4, %s2499_s8 }
  0x3e   : > { %466 = vrot.lane.b32.xlu0 %v2771_v9, %s2499_s8  ;;  %v2863_v9 = vld [vmem:[%s2594_s7 + $0x140] sm:$0xff] }
  0x41   : > { %472 = vrot.lane.b32.xlu1 %v2788_v20, %s2499_s8  ;;  %v2847_v20 = vld [vmem:[%s2594_s7 + $0x120] sm:$0xff] }
  0x42   : > { %470 = vrot.lane.b32.xlu0 %v2793_v27, %s2499_s8  ;;  %v2859_v27 = vsel %vm357_vm0, %v413_v21, %v414_v6  ;;  %v418_v4 = vrot.slane %v2847_v20, 1  ;;  %v424_v6 = vrot.slane %v2863_v9, 1  ;;  %v426_v21 = vrot.slane %v2866_v57, 1 }
  0x43   : > { %4562 = vst [vmem:[#allocation21_spill] sm:$0xff] %v2859_v27 }
  0x44   : > { %v2881_v49 = vsel %vm357_vm0, %v418_v4, %v419_v43  ;;  %v2898_v51 = vsel %vm357_vm0, %v424_v6, %v426_v21  ;;  %v429_v4 = vrot.slane %v2885_v41, 1  ;;  %v431_v43 = vrot.slane %v2888_v44, 1 }
  0x45   : > { %476 = vrot.lane.b32.xlu1 %v2810_v42, %s2499_s8  ;;  %4564 = vst [vmem:[#allocation23_spill] sm:$0xff] %v2881_v49  ;;  %4565 = vst [vmem:[#allocation24_spill] sm:$0xff] %v2898_v51 }
  0x46   : > { %474 = vrot.lane.b32.xlu0 %v2815_v50, %s2499_s8  ;;  %v2920_v21 = vsel %vm357_vm0, %v429_v4, %v431_v43  ;;  %v536_v43 = vrot.slane %v2608_v5, 2  ;;  %v543_v5 = vrot.slane %v2612_v7, 2  ;;  %v545_v7 = vrot.slane %v2630_v15, 2 }
  0x47   : > { %4569 = vst [vmem:[#allocation28_spill] sm:$0xff] %v2920_v21 }
  0x49   : > { %480 = vrot.lane.b32.xlu1 %v2832_v61, %s2499_s8  ;;  %v2910_v61 = vld [vmem:[%s2594_s7 + $0x178] sm:$0x3] }
  0x4a   : > { %478 = vrot.lane.b32.xlu0 %v2837_v13, %s2499_s8 }
  0x4d   : > { %484 = vrot.lane.b32.xlu1 %v2854_v45, %s2499_s8  ;;  %v2903_v45 = vsel %vm357_vm0, %v423_v52, %v424_v6  ;;  %v436_v6 = vrot.slane %v2910_v61, 1 }
  0x4e   : > { %482 = vrot.lane.b32.xlu0 %v2859_v27, %s2499_s8  ;;  %4566 = vst [vmem:[#allocation25_spill] sm:$0xff] %v2903_v45  ;;  %v2907_v27 = vld [vmem:[%s2594_s7 + $0x170] sm:$0xff] }
  0x4f   : > { %4567 = vst [vmem:[#allocation26_spill] sm:$0xff] %v2907_v27  ;;  %v434_v52 = vrot.slane %v2907_v27, 1 }
  0x51   : > { %488 = vrot.lane.b32.xlu1 %v2876_v8, %s2499_s8  ;;  %v2913_v8 = vld [vmem:[%s2594_s7 + $0x168] sm:$0xff] }
  0x52   : > { %486 = vrot.lane.b32.xlu0 %v2881_v49, %s2499_s8  ;;  %4568 = vst [vmem:[#allocation27_spill] sm:$0xff] %v2913_v8  ;;  %v2925_v49 = vsel %vm357_vm0, %v428_v36, %v429_v4  ;;  %v433_v13 = vrot.slane %v2913_v8, 1  ;;  %v535_v36 = vrot.slane %v2603_v2, 2 }
  0x53   : > { %4570 = vst [vmem:[#allocation29_spill] sm:$0xff] %v2925_v49 }
  0x54   : > { %v2938_v50 = vsel %vm357_vm0, %v433_v13, %v434_v52  ;;  %v540_v13 = vrot.slane %v2597_v0, 2 }
  0x55   : > { %492 = vrot.lane.b32.xlu1 %v2898_v51, %s2499_s8  ;;  %v2933_v51 = vsel %vm357_vm0, %v434_v52, %v436_v6  ;;  %4572 = vst [vmem:[#allocation31_spill] sm:$0xff] %v2938_v50  ;;  %v541_v6 = vrot.slane %v2600_v1, 2  ;;  %v546_v52 = vrot.slane %v2620_v11, 2 }
  0x56   : > { %490 = vrot.lane.b32.xlu0 %v2903_v45, %s2499_s8  ;;  %4571 = vst [vmem:[#allocation30_spill] sm:$0xff] %v2933_v51  ;;  %v538_v45 = vrot.slane %v2617_v10, 2  ;;  %v537_v10 = vsel %vm534_vm1, %v535_v36, %v536_v43  ;;  %v551_v36 = vrot.slane %v2644_v22, 2 }
  0x57   : > { %v2953_v2 = vsel %vm534_vm1, %v541_v6, %v543_v5 }
  0x58   : > { %v539_v4 = vsel %vm534_vm1, %v536_v43, %v538_v45  ;;  %v548_v45 = vrot.slane %v2627_v14, 2  ;;  %v2971_v14 = vsel %vm534_vm1, %v545_v7, %v546_v52  ;;  %v561_v7 = vrot.slane %v2687_v38, 2 }
  0x59   : > { %496 = vrot.lane.b32.xlu1 %v2920_v21, %s2499_s8  ;;  %v573_v21 = vrot.slane %v2734_v55, 2 }
  0x5a   : > { %494 = vrot.lane.b32.xlu0 %v2925_v49, %s2499_s8  ;;  %v2966_v43 = vsel %vm534_vm1, %v546_v52, %v548_v45  ;;  %v555_v52 = vrot.slane %v2671_v32, 2  ;;  %v578_v49 = vrot.slane %v2756_v63, 2 }
  0x5b   : > { %4573 = vst [vmem:[#allocation32_spill] sm:$0xff] %v2966_v43 }
  0x5d   : > { %500 = vrot.lane.b32.xlu1 %v2933_v51, %s2499_s8  ;;  %v2958_v51 = vsel %vm534_vm1, %v540_v13, %v541_v6  ;;  %v550_v6 = vrot.slane %v2650_v24, 2  ;;  %v558_v13 = vrot.slane %v2668_v31, 2 }
  0x5e   : > { %498 = vrot.lane.b32.xlu0 %v2938_v50, %s2499_s8  ;;  %v568_v50 = vrot.slane %v2712_v47, 2 }
  0x61   : > { %617 = vrot.lane.b32.xlu1 %v539_v4, %s2500_s9  ;;  %v553_v4 = vrot.slane %v2647_v23, 2  ;;  %v2984_v23 = vsel %vm534_vm1, %v550_v6, %v551_v36 }
  0x62   : > { %615 = vrot.lane.b32.xlu0 %v537_v10, %s2500_s9  ;;  %v556_v10 = vrot.slane %v2665_v30, 2  ;;  %4575 = vst [vmem:[#allocation34_spill] sm:$0xff] %v2984_v23 }
  0x63   : > { %v2979_v5 = vsel %vm534_vm1, %v551_v36, %v553_v4  ;;  %v563_v4 = vrot.slane %v2690_v39, 2  ;;  %v560_v36 = vrot.slane %v2693_v40, 2 }
  0x64   : > { %4574 = vst [vmem:[#allocation33_spill] sm:$0xff] %v2979_v5  ;;  %v2992_v45 = vsel %vm534_vm1, %v556_v10, %v558_v13  ;;  %v2997_v31 = vsel %vm534_vm1, %v555_v52, %v556_v10  ;;  %v566_v13 = vrot.slane %v2709_v46, 2  ;;  %v565_v10 = vrot.slane %v2715_v48, 2 }
  0x65   : > { %621 = vrot.lane.b32.xlu1 %v2953_v2, %s2500_s9  ;;  %4576 = vst [vmem:[#allocation35_spill] sm:$0xff] %v2992_v45  ;;  %4577 = vst [vmem:[#allocation36_spill] sm:$0xff] %v2997_v31  ;;  %v3005_v6 = vsel %vm534_vm1, %v561_v7, %v563_v4  ;;  %v3010_v39 = vsel %vm534_vm1, %v560_v36, %v561_v7  ;;  %v571_v4 = vrot.slane %v2731_v54, 2  ;;  %v570_v7 = vrot.slane %v2737_v56, 2 }
  0x66   : > { %619 = vrot.lane.b32.xlu0 %v2958_v51, %s2500_s9  ;;  %4578 = vst [vmem:[#allocation37_spill] sm:$0xff] %v3005_v6  ;;  %4579 = vst [vmem:[#allocation38_spill] sm:$0xff] %v3010_v39  ;;  %v3018_v52 = vsel %vm534_vm1, %v566_v13, %v568_v50  ;;  %v3023_v47 = vsel %vm534_vm1, %v565_v10, %v566_v13  ;;  %v576_v50 = vrot.slane %v2753_v62, 2  ;;  %v575_v13 = vrot.slane %v2759_v3, 2 }
  0x67   : > { %4580 = vst [vmem:[#allocation39_spill] sm:$0xff] %v3018_v52  ;;  %4581 = vst [vmem:[#allocation40_spill] sm:$0xff] %v3023_v47  ;;  %v3031_v36 = vsel %vm534_vm1, %v571_v4, %v573_v21  ;;  %v3036_v55 = vsel %vm534_vm1, %v570_v7, %v571_v4  ;;  %v581_v21 = vrot.slane %v2775_v16, 2  ;;  %v580_v4 = vrot.slane %v2781_v19, 2 }
  0x68   : > { %4582 = vst [vmem:[#allocation41_spill] sm:$0xff] %v3031_v36  ;;  %4583 = vst [vmem:[#allocation42_spill] sm:$0xff] %v3036_v55  ;;  %v3044_v10 = vsel %vm534_vm1, %v576_v50, %v578_v49  ;;  %v3049_v63 = vsel %vm534_vm1, %v575_v13, %v576_v50  ;;  %v586_v49 = vrot.slane %v2797_v34, 2  ;;  %v585_v50 = vrot.slane %v2803_v37, 2 }
  0x69   : > { %625 = vrot.lane.b32.xlu1 %v2966_v43, %s2500_s9  ;;  %4584 = vst [vmem:[#allocation43_spill] sm:$0xff] %v3044_v10  ;;  %4585 = vst [vmem:[#allocation44_spill] sm:$0xff] %v3049_v63 }
  0x6a   : > { %623 = vrot.lane.b32.xlu0 %v2971_v14, %s2500_s9 }
  0x6d   : > { %629 = vrot.lane.b32.xlu1 %v2979_v5, %s2500_s9 }
  0x6e   : > { %627 = vrot.lane.b32.xlu0 %v2984_v23, %s2500_s9 }
  0x71   : > { %633 = vrot.lane.b32.xlu1 %v2992_v45, %s2500_s9 }
  0x72   : > { %631 = vrot.lane.b32.xlu0 %v2997_v31, %s2500_s9 }
  0x75   : > { %637 = vrot.lane.b32.xlu1 %v3005_v6, %s2500_s9 }
  0x76   : > { %635 = vrot.lane.b32.xlu0 %v3010_v39, %s2500_s9 }
  0x79   : > { %641 = vrot.lane.b32.xlu1 %v3018_v52, %s2500_s9  ;;  %v583_v52 = vrot.slane %v2778_v18, 2  ;;  %v3062_v18 = vsel %vm534_vm1, %v580_v4, %v581_v21 }
  0x7a   : > { %639 = vrot.lane.b32.xlu0 %v3023_v47, %s2500_s9  ;;  %v608_v47 = vrot.slane %v2888_v44, 2  ;;  %v611_v44 = vrot.slane %v2907_v27, 2 }
  0x7b   : > { %v3057_v7 = vsel %vm534_vm1, %v581_v21, %v583_v52  ;;  %v591_v52 = vrot.slane %v2819_v53, 2  ;;  %v590_v21 = vrot.slane %v2825_v59, 2 }
  0x7d   : > { %645 = vrot.lane.b32.xlu1 %v3031_v36, %s2500_s9  ;;  %v588_v36 = vrot.slane %v2800_v35, 2  ;;  %v3075_v35 = vsel %vm534_vm1, %v585_v50, %v586_v49 }
  0x7e   : > { %643 = vrot.lane.b32.xlu0 %v3036_v55, %s2500_s9  ;;  %v603_v55 = vrot.slane %v2866_v57, 2 }
  0x7f   : > { %v3070_v13 = vsel %vm534_vm1, %v586_v49, %v588_v36  ;;  %v596_v36 = vrot.slane %v2841_v26, 2  ;;  %v595_v49 = vrot.slane %v2847_v20, 2 }
  0x80   : > { %4586 = vst [vmem:[#allocation45_spill] sm:$0xff] %v3070_v13 }
  0x81   : > { %649 = vrot.lane.b32.xlu1 %v3044_v10, %s2500_s9  ;;  %v593_v10 = vrot.slane %v2822_v58, 2  ;;  %v3088_v58 = vsel %vm534_vm1, %v590_v21, %v591_v52 }
  0x82   : > { %647 = vrot.lane.b32.xlu0 %v3049_v63, %s2500_s9  ;;  %v598_v63 = vrot.slane %v2844_v29, 2  ;;  %4588 = vst [vmem:[#allocation47_spill] sm:$0xff] %v3088_v58  ;;  %v3101_v29 = vsel %vm534_vm1, %v595_v49, %v596_v36 }
  0x83   : > { %v3083_v4 = vsel %vm534_vm1, %v591_v52, %v593_v10  ;;  %v601_v10 = vrot.slane %v2863_v9, 2  ;;  %4590 = vst [vmem:[#allocation49_spill] sm:$0xff] %v3101_v29  ;;  %v600_v52 = vrot.slane %v2869_v60, 2 }
  0x84   : > { %4587 = vst [vmem:[#allocation46_spill] sm:$0xff] %v3083_v4  ;;  %v3096_v50 = vsel %vm534_vm1, %v596_v36, %v598_v63  ;;  %v606_v63 = vrot.slane %v2885_v41, 2  ;;  %v605_v36 = vrot.slane %v2891_v33, 2 }
  0x85   : > { %653 = vrot.lane.b32.xlu1 %v3057_v7, %s2500_s9  ;;  %4589 = vst [vmem:[#allocation48_spill] sm:$0xff] %v3096_v50  ;;  %v3109_v21 = vsel %vm534_vm1, %v601_v10, %v603_v55  ;;  %v3116_v57 = vsel %vm534_vm1, %v600_v52, %v601_v10  ;;  %v610_v52 = vrot.slane %v2913_v8, 2 }
  0x86   : > { %651 = vrot.lane.b32.xlu0 %v3062_v18, %s2500_s9  ;;  %4591 = vst [vmem:[#allocation50_spill] sm:$0xff] %v3109_v21  ;;  %4593 = vst [vmem:[#allocation52_spill] sm:$0xff] %v3116_v57  ;;  %v3126_v55 = vsel %vm534_vm1, %v606_v63, %v608_v47  ;;  %v3133_v10 = vsel %vm534_vm1, %v605_v36, %v606_v63 }
  0x87   : > { %4595 = vst [vmem:[#allocation54_spill] sm:$0xff] %v3126_v55  ;;  %4597 = vst [vmem:[#allocation56_spill] sm:$0xff] %v3133_v10 }
  0x89   : > { %657 = vrot.lane.b32.xlu1 %v3070_v13, %s2500_s9 }
  0x8a   : > { %655 = vrot.lane.b32.xlu0 %v3075_v35, %s2500_s9 }
  0x8d   : > { %661 = vrot.lane.b32.xlu1 %v3083_v4, %s2500_s9 }
  0x8e   : > { %659 = vrot.lane.b32.xlu0 %v3088_v58, %s2500_s9 }
  0x91   : > { %665 = vrot.lane.b32.xlu1 %v3096_v50, %s2500_s9 }
  0x92   : > { %663 = vrot.lane.b32.xlu0 %v3101_v29, %s2500_s9 }
  0x93   : > { %v3113_v6 = vpop.permute.xlu1 %442 }
  0x94   : > { %4592 = vst [vmem:[#allocation51_spill] sm:$0xff] %v3113_v6  ;;  %v3119_v49 = vpop.permute.xlu0 %438  ;;  %v613_v6 = vrot.slane %v2910_v61, 2  ;;  %v3148_v61 = vsel %vm534_vm1, %v610_v52, %v611_v44 }
  0x95   : > { %4594 = vst [vmem:[#allocation53_spill] sm:$0xff] %v3119_v49  ;;  %669 = vrot.lane.b32.xlu1 %v3109_v21, %s2500_s9  ;;  %4600 = vst [vmem:[#allocation59_spill] sm:$0xff] %v3148_v61 }
  0x96   : > { %667 = vrot.lane.b32.xlu0 %v3116_v57, %s2500_s9  ;;  %v3143_v47 = vsel %vm534_vm1, %v611_v44, %v613_v6 }
  0x97   : > { %v3130_v39 = vpop.permute.xlu1 %444  ;;  %4599 = vst [vmem:[#allocation58_spill] sm:$0xff] %v3143_v47 }
  0x98   : > { %4596 = vst [vmem:[#allocation55_spill] sm:$0xff] %v3130_v39  ;;  %v3136_v49 = vpop.permute.xlu0 %440 }
  0x99   : > { %4598 = vst [vmem:[#allocation57_spill] sm:$0xff] %v3136_v49  ;;  %673 = vrot.lane.b32.xlu1 %v3126_v55, %s2500_s9 }
  0x9a   : > { %671 = vrot.lane.b32.xlu0 %v3133_v10, %s2500_s9 }
  0x9b   : > { %v3145_v21 = vpop.permute.xlu1 %448 }
  0x9c   : > { %v3150_v63 = vpop.permute.xlu0 %446 }
  0x9d   : > { %677 = vrot.lane.b32.xlu1 %v3143_v47, %s2500_s9 }
  0x9e   : > { %675 = vrot.lane.b32.xlu0 %v3148_v61, %s2500_s9 }
  0x9f   : > { %v3156_v36 = vpop.permute.xlu1 %452 }
  0xa0   : > { %v3158_v55 = vpop.permute.xlu0 %450 }
  0xa1   : > { %715 = vrot.lane.b32.xlu1 %v2600_v1, %s2501_s10 }
  0xa2   : > { %713 = vrot.lane.b32.xlu0 %v2597_v0, %s2501_s10 }
  0xa3   : > { %v3164_v6 = vpop.permute.xlu1 %456 }
  0xa4   : > { %v3166_v44 = vpop.permute.xlu0 %454 }
  0xa5   : > { %719 = vrot.lane.b32.xlu1 %v2620_v11, %s2501_s10 }
  0xa6   : > { %717 = vrot.lane.b32.xlu0 %v2630_v15, %s2501_s10 }
  0xa7   : > { %v3172_v52 = vpop.permute.xlu1 %460 }
  0xa8   : > { %v3174_v47 = vpop.permute.xlu0 %458 }
  0xa9   : > { %723 = vrot.lane.b32.xlu1 %v2644_v22, %s2501_s10 }
  0xaa   : > { %721 = vrot.lane.b32.xlu0 %v2650_v24, %s2501_s10 }
  0xab   : > { %v3180_v0 = vpop.permute.xlu1 %464 }
  0xac   : > { %v3182_v1 = vpop.permute.xlu0 %462 }
  0xad   : > { %727 = vrot.lane.b32.xlu1 %v2665_v30, %s2501_s10 }
  0xae   : > { %725 = vrot.lane.b32.xlu0 %v2671_v32, %s2501_s10 }
  0xaf   : > { %v3188_v61 = vpop.permute.xlu1 %468 }
  0xb0   : > { %v3190_v39 = vpop.permute.xlu0 %466 }
  0xb1   : > { %731 = vrot.lane.b32.xlu1 %v2687_v38, %s2501_s10 }
  0xb2   : > { %729 = vrot.lane.b32.xlu0 %v2693_v40, %s2501_s10 }
  0xb3   : > { %v3196_v10 = vpop.permute.xlu1 %472 }
  0xb4   : > { %4601 = vst [vmem:[#allocation60_spill] sm:$0xff] %v3196_v10  ;;  %v3198_v49 = vpop.permute.xlu0 %470 }
  0xb5   : > { %4602 = vst [vmem:[#allocation61_spill] sm:$0xff] %v3198_v49  ;;  %735 = vrot.lane.b32.xlu1 %v2709_v46, %s2501_s10 }
  0xb6   : > { %733 = vrot.lane.b32.xlu0 %v2715_v48, %s2501_s10 }
  0xb7   : > { %v3204_v57 = vpop.permute.xlu1 %476 }
  0xb8   : > { %4603 = vst [vmem:[#allocation62_spill] sm:$0xff] %v3204_v57  ;;  %v3206_v45 = vpop.permute.xlu0 %474 }
  0xb9   : > { %4604 = vst [vmem:[#allocation63_spill] sm:$0xff] %v3206_v45  ;;  %739 = vrot.lane.b32.xlu1 %v2731_v54, %s2501_s10 }
  0xba   : > { %737 = vrot.lane.b32.xlu0 %v2737_v56, %s2501_s10 }
  0xbb   : > { %v3212_v50 = vpop.permute.xlu1 %480 }
  0xbc   : > { %v3214_v10 = vpop.permute.xlu0 %478 }
  0xbd   : > { %743 = vrot.lane.b32.xlu1 %v2753_v62, %s2501_s10 }
  0xbe   : > { %741 = vrot.lane.b32.xlu0 %v2759_v3, %s2501_s10 }
  0xbf   : > { %v3220_v49 = vpop.permute.xlu1 %484 }
  0xc0   : > { %v3222_v57 = vpop.permute.xlu0 %482 }
  0xc1   : > { %747 = vrot.lane.b32.xlu1 %v2775_v16, %s2501_s10 }
  0xc2   : > { %745 = vrot.lane.b32.xlu0 %v2781_v19, %s2501_s10 }
  0xc3   : > { %v3228_v45 = vpop.permute.xlu1 %488 }
  0xc4   : > { %v3230_v31 = vpop.permute.xlu0 %486 }
  0xc5   : > { %751 = vrot.lane.b32.xlu1 %v2797_v34, %s2501_s10 }
  0xc6   : > { %749 = vrot.lane.b32.xlu0 %v2803_v37, %s2501_s10 }
  0xc7   : > { %v3236_v62 = vpop.permute.xlu1 %492 }
  0xc8   : > { %v3238_v3 = vpop.permute.xlu0 %490 }
  0xc9   : > { %755 = vrot.lane.b32.xlu1 %v2819_v53, %s2501_s10 }
  0xca   : > { %753 = vrot.lane.b32.xlu0 %v2825_v59, %s2501_s10 }
  0xcb   : > { %v3244_v16 = vpop.permute.xlu1 %496 }
  0xcc   : > { %v3246_v19 = vpop.permute.xlu0 %494 }
  0xcd   : > { %759 = vrot.lane.b32.xlu1 %v2841_v26, %s2501_s10 }
  0xce   : > { %757 = vrot.lane.b32.xlu0 %v2847_v20, %s2501_s10 }
  0xcf   : > { %v3252_v29 = vpop.permute.xlu1 %500 }
  0xd0   : > { %4605 = vst [vmem:[#allocation64_spill] sm:$0xff] %v3252_v29  ;;  %v3254_v5 = vpop.permute.xlu0 %498 }
  0xd1   : > { %4606 = vst [vmem:[#allocation65_spill] sm:$0xff] %v3254_v5  ;;  %763 = vrot.lane.b32.xlu1 %v2863_v9, %s2501_s10  ;;  %v3283_v5 = vld [vmem:[%s2594_s7 + $0x180] sm:$0xff] }
  0xd2   : > { %761 = vrot.lane.b32.xlu0 %v2869_v60, %s2501_s10 }
  0xd3   : > { %v3260_v4 = vpop.permute.xlu1 %617 }
  0xd4   : > { %4607 = vst [vmem:[#allocation66_spill] sm:$0xff] %v3260_v4  ;;  %v3262_v23 = vpop.permute.xlu0 %615  ;;  %v3277_v4 = vld [vmem:[%s2594_s7 + $0x188] sm:$0xff] }
  0xd5   : > { %4608 = vst [vmem:[#allocation67_spill] sm:$0xff] %v3262_v23  ;;  %767 = vrot.lane.b32.xlu1 %v2885_v41, %s2501_s10  ;;  %v1319_v23 = vsel %vm1313_vm2, %v2620_v11, %v3145_v21  ;;  %v1321_v21 = vsel %vm1313_vm2, %v2644_v22, %v3156_v36 }
  0xd6   : > { %765 = vrot.lane.b32.xlu0 %v2891_v33, %s2501_s10 }
  0xd7   : > { %v3268_v58 = vpop.permute.xlu1 %621 }
  0xd8   : > { %4609 = vst [vmem:[#allocation68_spill] sm:$0xff] %v3268_v58  ;;  %v3270_v43 = vpop.permute.xlu0 %619  ;;  %v1318_v58 = vsel %vm1313_vm2, %v2630_v15, %v3150_v63  ;;  %v1323_v63 = vsel %vm1313_vm2, %v2665_v30, %v3164_v6  ;;  %v1324_v6 = vsel %vm1313_vm2, %v2693_v40, %v3174_v47  ;;  %v1326_v40 = vsel %vm1313_vm2, %v2715_v48, %v3182_v1 }
  0xd9   : > { %4610 = vst [vmem:[#allocation69_spill] sm:$0xff] %v3270_v43  ;;  %771 = vrot.lane.b32.xlu1 %v2907_v27, %s2501_s10  ;;  %v1328_v48 = vsel %vm1313_vm2, %v2737_v56, %v3190_v39 }
  0xda   : > { %769 = vrot.lane.b32.xlu0 %v2913_v8, %s2501_s10 }
  0xdb   : > { %v626_v13 = vpop.permute.xlu1 %625 }
  0xdc   : > { %v3289_v43 = vsel %vm1346_vm3, %v1319_v23, %v626_v13  ;;  %v624_v27 = vpop.permute.xlu0 %623  ;;  %v1320_v23 = vsel %vm1313_vm2, %v2650_v24, %v3158_v55 }
  0xdd   : > { %v3292_v8 = vsel %vm1346_vm3, %v1318_v58, %v624_v27  ;;  %775 = vrot.lane.b32.xlu1 %v3277_v4, %s2501_s10 }
  0xde   : > { %773 = vrot.lane.b32.xlu0 %v3283_v5, %s2501_s10  ;;  %s2507_s10 = smov [#allocation2]  }
  0xdf   : > { %v630_v29 = vpop.permute.xlu1 %629 }
  0xe0   : > { %v3305_v13 = vsel %vm1346_vm3, %v1321_v21, %v630_v29  ;;  %v628_v27 = vpop.permute.xlu0 %627  ;;  %v1322_v29 = vsel %vm1313_vm2, %v2671_v32, %v3166_v44 }
  0xe1   : > { %v3308_v58 = vsel %vm1346_vm3, %v1320_v23, %v628_v27  ;;  %817 = vrot.lane.b32.xlu1 %v2637_v17, %s2502_s11 }
  0xe2   : > { %815 = vrot.lane.b32.xlu0 %v2623_v12, %s2502_s11  ;;  %v1325_v12 = vsel %vm1313_vm2, %v2687_v38, %v3172_v52  ;;  %v1327_v38 = vsel %vm1313_vm2, %v2709_v46, %v3180_v0  ;;  %v1329_v46 = vsel %vm1313_vm2, %v2731_v54, %v3188_v61  ;;  %v1578_v61 = vld [vmem:[%s4440_s1 + $0x8] sm:$0xff] }
  0xe3   : > { %v634_v36 = vpop.permute.xlu1 %633 }
  0xe4   : > { %v3321_v55 = vsel %vm1346_vm3, %v1323_v63, %v634_v36  ;;  %v632_v21 = vpop.permute.xlu0 %631  ;;  %v4611_v36 = vld [vmem:[#allocation17_spill] sm:$0xff] }
  0xe5   : > { %v3324_v23 = vsel %vm1346_vm3, %v1322_v29, %v632_v21  ;;  %821 = vrot.lane.b32.xlu1 %v2656_v25, %s2502_s11 }
  0xe6   : > { %819 = vrot.lane.b32.xlu0 %v2661_v28, %s2502_s11 }
  0xe7   : > { %v638_v17 = vpop.permute.xlu1 %637 }
  0xe8   : > { %v3337_v44 = vsel %vm1346_vm3, %v1325_v12, %v638_v17  ;;  %v636_v27 = vpop.permute.xlu0 %635 }
  0xe9   : > { %v3340_v63 = vsel %vm1346_vm3, %v1324_v6, %v636_v27  ;;  %849 = vrot.lane.b32.xlu1 %v2810_v42, %s2502_s11 }
  0xea   : > { %847 = vrot.lane.b32.xlu0 %v4611_v36, %s2502_s11 }
  0xeb   : > { %v642_v52 = vpop.permute.xlu1 %641 }
  0xec   : > { %v3353_v47 = vsel %vm1346_vm3, %v1327_v38, %v642_v52  ;;  %v640_v29 = vpop.permute.xlu0 %639  ;;  %v1334_v38 = vsel %vm1313_vm2, %v2803_v37, %v3214_v10  ;;  %v1337_v10 = vsel %vm1313_vm2, %v2819_v53, %v3220_v49 }
  0xed   : > { %v3356_v21 = vsel %vm1346_vm3, %v1326_v40, %v640_v29  ;;  %948 = vrot.lane.b32.xlu1 %v3062_v18, %s2503_s12 }
  0xee   : > { %916 = vrot.lane.b32.xlu0 %v2958_v51, %s2503_s12 }
  0xef   : > { %v646_v0 = vpop.permute.xlu1 %645 }
  0xf0   : > { %v3369_v1 = vsel %vm1346_vm3, %v1329_v46, %v646_v0  ;;  %v644_v12 = vpop.permute.xlu0 %643  ;;  %v1336_v0 = vsel %vm1313_vm2, %v2825_v59, %v3222_v57  ;;  %v1339_v57 = vsel %vm1313_vm2, %v2841_v26, %v3228_v45  ;;  %v4613_v45 = vld [vmem:[#allocation18_spill] sm:$0xff] }
  0xf1   : > { %v3372_v17 = vsel %vm1346_vm3, %v1328_v48, %v644_v12  ;;  %950 = vrot.lane.b32.xlu1 %v3057_v7, %s2503_s12 }
  0xf2   : > { %918 = vrot.lane.b32.xlu0 %v2953_v2, %s2503_s12  ;;  %v1577_v2 = vld [vmem:[%s4440_s1] sm:$0xff] }
  0xf3   : > { %v3378_v51 = vpop.permute.xlu1 %649  ;;  %v2322_v6 = vpack.c.bf16 %v1578_v61, %v1577_v2 }
  0xf4   : > { %v3380_v54 = vpop.permute.xlu0 %647 }
  0xf5   : > { %1046 = vrot.lane.b32.xlu1 %v2803_v37, %s2504_s13  ;;  %2323 = vmatprep.subr.bf16.mxu0 %v2322_v6  ;;  %v1580_v37 = vld [vmem:[%s4440_s1 + $0x18] sm:$0xff] }
  0xf6   : > { %1014 = vrot.lane.b32.xlu0 %v2630_v15, %s2504_s13  ;;  %v1335_v15 = vsel %vm1313_vm2, %v2797_v34, %v3212_v50  ;;  %2330 = vmatprep.subr.bf16.mxu1 %v2322_v6 }
  0xf7   : > { %v3386_v56 = vpop.permute.xlu1 %653  ;;  %2325 = vmatpush3.bf16.msra.mxu0 %v2322_v6  ;;  %2333 = vmatpush3.bf16.msra.mxu1 %v2322_v6 }
  0xf8   : > { %v3388_v39 = vpop.permute.xlu0 %651 }
  0xf9   : > { %1048 = vrot.lane.b32.xlu1 %v2797_v34, %s2504_s13  ;;  %v1579_v34 = vld [vmem:[%s4440_s1 + $0x10] sm:$0xff] }
  0xfa   : > { %1016 = vrot.lane.b32.xlu0 %v2620_v11, %s2504_s13  ;;  %v4612_v11 = vld [vmem:[#allocation19_spill] sm:$0xff]  ;;  %v2326_v50 = vpack.c.bf16 %v1580_v37, %v1579_v34 }
  0xfb   : > { %v658_v27 = vpop.permute.xlu1 %657 }
  0xfc   : > { %v3407_v52 = vsel %vm1346_vm3, %v1335_v15, %v658_v27  ;;  %v656_v40 = vpop.permute.xlu0 %655  ;;  %2327 = vmatprep.subr.bf16.mxu0 %v2326_v50  ;;  %2331 = vmatprep.subr.bf16.mxu1 %v2326_v50 }
  0xfd   : > { %v3410_v29 = vsel %vm1346_vm3, %v1334_v38, %v656_v40  ;;  %1148 = vrot.lane.b32.xlu1 %v4612_v11, %s2505_s26  ;;  %2329 = vmatpush3.bf16.msra.mxu0 %v2326_v50  ;;  %v1340_v38 = vsel %vm1313_vm2, %v2869_v60, %v3238_v3  ;;  %v1342_v3 = vsel %vm1313_vm2, %v2891_v33, %v3246_v19  ;;  %v4617_v33 = vld [vmem:[#allocation27_spill] sm:$0xff] }
  0xfe   : > { %1116 = vrot.lane.b32.xlu0 %v2661_v28, %s2505_s26  ;;  %2334 = vmatpush3.bf16.msra.mxu1 %v2326_v50  ;;  %v1581_v28 = vld [vmem:[%s4440_s1 + $0x20] sm:$0xf] }
  0xff   : > { %v662_v46 = vpop.permute.xlu1 %661  ;;  %2272 = vmatprep.subr.msk.mxu0 %vm1679_vm4, %v1581_v28  ;;  %2332 = vmatprep.subr.msk.mxu1 %vm1679_vm4, %v1581_v28 }
 0x100   : > { %v3429_v48 = vsel %vm1346_vm3, %v1337_v10, %v662_v46  ;;  %v660_v12 = vpop.permute.xlu0 %659 }
 0x101   : > { %v3432_v2 = vsel %vm1346_vm3, %v1336_v0, %v660_v12  ;;  %1118 = vrot.lane.b32.xlu1 %v2656_v25, %s2505_s26  ;;  %v1338_v25 = vsel %vm1313_vm2, %v2847_v20, %v3230_v31  ;;  %2273 = vmatpush3.msk.msra.mxu0 %vm1679_vm4, %v1581_v28  ;;  %v1341_v31 = vsel %vm1313_vm2, %v2863_v9, %v3236_v62  ;;  %v4614_v0 = vld [vmem:[#allocation64_spill] sm:$0xff] }
 0x102   : > { %851 = vrot.lane.b32.xlu0 %v4612_v11, %s2502_s11  ;;  %2335 = vmatpush3.msk.msra.mxu1 %vm1679_vm4, %v1581_v28  ;;  %v1343_v62 = vsel %vm1313_vm2, %v2885_v41, %v3244_v16  ;;  %v4615_v41 = vld [vmem:[#allocation26_spill] sm:$0xff]  ;;  %v4616_v28 = vld [vmem:[#allocation65_spill] sm:$0xff] }
 0x103   : > { %v666_v49 = vpop.permute.xlu1 %665  ;;  %v1345_v16 = vsel %vm1313_vm2, %v4615_v41, %v4614_v0  ;;  %v1344_v19 = vsel %vm1313_vm2, %v4617_v33, %v4616_v28 }
 0x104   : > { %v3448_v61 = vsel %vm1346_vm3, %v1339_v57, %v666_v49  ;;  %v664_v6 = vpop.permute.xlu0 %663 }
 0x105   : > { %v3451_v15 = vsel %vm1346_vm3, %v1338_v25, %v664_v6  ;;  %1217 = vrot.lane.b32.xlu1 %v2971_v14, %s2506_s14 }
 0x106   : > { %1150 = vrot.lane.b32.xlu0 %v4613_v45, %s2505_s26 }
 0x107   : > { %v670_v27 = vpop.permute.xlu1 %669 }
 0x108   : > { %v3464_v40 = vsel %vm1346_vm3, %v1341_v31, %v670_v27  ;;  %v668_v11 = vpop.permute.xlu0 %667 }
 0x109   : > { %v3467_v34 = vsel %vm1346_vm3, %v1340_v38, %v668_v11  ;;  %853 = vrot.lane.b32.xlu1 %v4613_v45, %s2502_s11 }
 0x10a   : > { %1249 = vrot.lane.b32.xlu0 %v3075_v35, %s2506_s14 }
 0x10b   : > { %v674_v37 = vpop.permute.xlu1 %673 }
 0x10c   : > { %v3480_v50 = vsel %vm1346_vm3, %v1343_v62, %v674_v37  ;;  %v672_v10 = vpop.permute.xlu0 %671 }
 0x10d   : > { %v3483_v46 = vsel %vm1346_vm3, %v1342_v3, %v672_v10  ;;  %952 = vrot.lane.b32.xlu1 %v3075_v35, %s2503_s12  ;;  %v4618_v35 = vld [vmem:[#allocation45_spill] sm:$0xff] }
 0x10e   : > { %920 = vrot.lane.b32.xlu0 %v2971_v14, %s2503_s12  ;;  %v4619_v14 = vld [vmem:[#allocation32_spill] sm:$0xff]  ;;  %v4620_v10 = vld [vmem:[#allocation21_spill] sm:$0xff] }
 0x10f   : > { %v678_v12 = vpop.permute.xlu1 %677 }
 0x110   : > { %v3496_v57 = vsel %vm1346_vm3, %v1345_v16, %v678_v12  ;;  %v676_v49 = vpop.permute.xlu0 %675  ;;  %v4622_v12 = vld [vmem:[#allocation20_spill] sm:$0xff] }
 0x111   : > { %v3499_v25 = vsel %vm1346_vm3, %v1344_v19, %v676_v49  ;;  %1251 = vrot.lane.b32.xlu1 %v4618_v35, %s2506_s14  ;;  %v4625_v49 = vld [vmem:[#allocation47_spill] sm:$0xff] }
 0x112   : > { %1219 = vrot.lane.b32.xlu0 %v4619_v14, %s2506_s14 }
 0x113   : > { %v3505_v6 = vpop.permute.xlu1 %715 }
 0x114   : > { %v3507_v45 = vpop.permute.xlu0 %713 }
 0x115   : > { %954 = vrot.lane.b32.xlu1 %v4618_v35, %s2503_s12 }
 0x116   : > { %922 = vrot.lane.b32.xlu0 %v4619_v14, %s2503_s12 }
 0x117   : > { %v3513_v31 = vpop.permute.xlu1 %719 }
 0x118   : > { %v3515_v27 = vpop.permute.xlu0 %717 }
 0x119   : > { %1050 = vrot.lane.b32.xlu1 %v2825_v59, %s2504_s13 }
 0x11a   : > { %1018 = vrot.lane.b32.xlu0 %v2650_v24, %s2504_s13 }
 0x11b   : > { %v724_v38 = vpop.permute.xlu1 %723 }
 0x11c   : > { %v3523_v11 = vsel %vm1379_vm5, %v3289_v43, %v724_v38  ;;  %v722_v62 = vpop.permute.xlu0 %721 }
 0x11d   : > { %v3527_v37 = vsel %vm1379_vm5, %v3292_v8, %v722_v62  ;;  %1052 = vrot.lane.b32.xlu1 %v2819_v53, %s2504_s13  ;;  %v4621_v8 = vld [vmem:[#allocation6_spill] sm:$0xff] }
 0x11e   : > { %1020 = vrot.lane.b32.xlu0 %v2644_v22, %s2504_s13 }
 0x11f   : > { %v728_v59 = vpop.permute.xlu1 %727 }
 0x120   : > { %v3535_v24 = vsel %vm1379_vm5, %v3305_v13, %v728_v59  ;;  %v726_v3 = vpop.permute.xlu0 %725  ;;  %v4629_v59 = vld [vmem:[#allocation46_spill] sm:$0xff] }
 0x121   : > { %v3539_v43 = vsel %vm1379_vm5, %v3308_v58, %v726_v3  ;;  %1152 = vrot.lane.b32.xlu1 %v4620_v10, %s2505_s26  ;;  %v4630_v3 = vld [vmem:[#allocation33_spill] sm:$0xff] }
 0x122   : > { %1120 = vrot.lane.b32.xlu0 %v4621_v8, %s2505_s26 }
 0x123   : > { %v732_v53 = vpop.permute.xlu1 %731 }
 0x124   : > { %v3547_v22 = vsel %vm1379_vm5, %v3321_v55, %v732_v53  ;;  %v730_v0 = vpop.permute.xlu0 %729 }
 0x125   : > { %v3551_v13 = vsel %vm1379_vm5, %v3324_v23, %v730_v0  ;;  %855 = vrot.lane.b32.xlu1 %v4620_v10, %s2502_s11  ;;  %v4623_v23 = vld [vmem:[#allocation5_spill] sm:$0xff] }
 0x126   : > { %823 = vrot.lane.b32.xlu0 %v4621_v8, %s2502_s11 }
 0x127   : > { %v736_v58 = vpop.permute.xlu1 %735 }
 0x128   : > { %v3559_v41 = vsel %vm1379_vm5, %v3337_v44, %v736_v58  ;;  %v734_v16 = vpop.permute.xlu0 %733 }
 0x129   : > { %v3563_v55 = vsel %vm1379_vm5, %v3340_v63, %v734_v16  ;;  %1154 = vrot.lane.b32.xlu1 %v4622_v12, %s2505_s26  ;;  %v4626_v63 = vld [vmem:[#allocation34_spill] sm:$0xff] }
 0x12a   : > { %1122 = vrot.lane.b32.xlu0 %v4623_v23, %s2505_s26 }
 0x12b   : > { %v740_v28 = vpop.permute.xlu1 %739 }
 0x12c   : > { %v3571_v33 = vsel %vm1379_vm5, %v3353_v47, %v740_v28  ;;  %v738_v19 = vpop.permute.xlu0 %737 }
 0x12d   : > { %4624 = vst [vmem:[#allocation17_spill] sm:$0xff] %v3571_v33  ;;  %v3575_v44 = vsel %vm1379_vm5, %v3356_v21, %v738_v19  ;;  %1253 = vrot.lane.b32.xlu1 %v4625_v49, %s2506_s14  ;;  %v4631_v19 = vld [vmem:[#allocation23_spill] sm:$0xff] }
 0x12e   : > { %1221 = vrot.lane.b32.xlu0 %v4626_v63, %s2506_s14 }
 0x12f   : > { %v744_v35 = vpop.permute.xlu1 %743 }
 0x130   : > { %v3583_v14 = vsel %vm1379_vm5, %v3369_v1, %v744_v35  ;;  %v742_v38 = vpop.permute.xlu0 %741 }
 0x131   : > { %4627 = vst [vmem:[#allocation19_spill] sm:$0xff] %v3583_v14  ;;  %v3587_v47 = vsel %vm1379_vm5, %v3372_v17, %v742_v38  ;;  %857 = vrot.lane.b32.xlu1 %v4622_v12, %s2502_s11  ;;  %v4635_v38 = vld [vmem:[#allocation22_spill] sm:$0xff]  ;;  %v4643_v14 = vld [vmem:[#allocation67_spill] sm:$0xff] }
 0x132   : > { %4628 = vst [vmem:[#allocation18_spill] sm:$0xff] %v3587_v47  ;;  %825 = vrot.lane.b32.xlu0 %v4623_v23, %s2502_s11 }
 0x133   : > { %v3593_v21 = vpop.permute.xlu1 %747 }
 0x134   : > { %v3595_v62 = vpop.permute.xlu0 %745 }
 0x135   : > { %956 = vrot.lane.b32.xlu1 %v4625_v49, %s2503_s12 }
 0x136   : > { %924 = vrot.lane.b32.xlu0 %v4626_v63, %s2503_s12 }
 0x137   : > { %v3601_v1 = vpop.permute.xlu1 %751 }
 0x138   : > { %v3603_v17 = vpop.permute.xlu0 %749 }
 0x139   : > { %1255 = vrot.lane.b32.xlu1 %v4629_v59, %s2506_s14 }
 0x13a   : > { %1223 = vrot.lane.b32.xlu0 %v4630_v3, %s2506_s14 }
 0x13b   : > { %v756_v10 = vpop.permute.xlu1 %755 }
 0x13c   : > { %v3611_v8 = vsel %vm1379_vm5, %v3407_v52, %v756_v10  ;;  %v754_v53 = vpop.permute.xlu0 %753  ;;  %v4637_v10 = vld [vmem:[#allocation49_spill] sm:$0xff] }
 0x13d   : > { %v3615_v0 = vsel %vm1379_vm5, %v3410_v29, %v754_v53  ;;  %958 = vrot.lane.b32.xlu1 %v4629_v59, %s2503_s12 }
 0x13e   : > { %926 = vrot.lane.b32.xlu0 %v4630_v3, %s2503_s12 }
 0x13f   : > { %v760_v58 = vpop.permute.xlu1 %759 }
 0x140   : > { %v3623_v16 = vsel %vm1379_vm5, %v3429_v48, %v760_v58  ;;  %v758_v12 = vpop.permute.xlu0 %757 }
 0x141   : > { %v3627_v52 = vsel %vm1379_vm5, %v3432_v2, %v758_v12  ;;  %1054 = vrot.lane.b32.xlu1 %v2847_v20, %s2504_s13 }
 0x142   : > { %1022 = vrot.lane.b32.xlu0 %v2671_v32, %s2504_s13 }
 0x143   : > { %v764_v29 = vpop.permute.xlu1 %763 }
 0x144   : > { %v3635_v23 = vsel %vm1379_vm5, %v3448_v61, %v764_v29  ;;  %v762_v28 = vpop.permute.xlu0 %761 }
 0x145   : > { %v3639_v48 = vsel %vm1379_vm5, %v3451_v15, %v762_v28  ;;  %1056 = vrot.lane.b32.xlu1 %v2841_v26, %s2504_s13  ;;  %v4632_v15 = vld [vmem:[#allocation8_spill] sm:$0xff] }
 0x146   : > { %1024 = vrot.lane.b32.xlu0 %v2665_v30, %s2504_s13 }
 0x147   : > { %v768_v20 = vpop.permute.xlu1 %767 }
 0x148   : > { %v3647_v32 = vsel %vm1379_vm5, %v3464_v40, %v768_v20  ;;  %v766_v2 = vpop.permute.xlu0 %765  ;;  %v4639_v20 = vld [vmem:[#allocation48_spill] sm:$0xff] }
 0x149   : > { %v3651_v61 = vsel %vm1379_vm5, %v3467_v34, %v766_v2  ;;  %1156 = vrot.lane.b32.xlu1 %v4631_v19, %s2505_s26  ;;  %v4640_v2 = vld [vmem:[#allocation35_spill] sm:$0xff] }
 0x14a   : > { %1124 = vrot.lane.b32.xlu0 %v4632_v15, %s2505_s26 }
 0x14b   : > { %v772_v26 = vpop.permute.xlu1 %771 }
 0x14c   : > { %v3659_v30 = vsel %vm1379_vm5, %v3480_v50, %v772_v26  ;;  %v770_v49 = vpop.permute.xlu0 %769 }
 0x14d   : > { %v3663_v40 = vsel %vm1379_vm5, %v3483_v46, %v770_v49  ;;  %859 = vrot.lane.b32.xlu1 %v4631_v19, %s2502_s11  ;;  %v4636_v46 = vld [vmem:[#allocation7_spill] sm:$0xff] }
 0x14e   : > { %827 = vrot.lane.b32.xlu0 %v4632_v15, %s2502_s11 }
 0x14f   : > { %v776_v34 = vpop.permute.xlu1 %775 }
 0x150   : > { %v3671_v63 = vsel %vm1379_vm5, %v3496_v57, %v776_v34  ;;  %v774_v35 = vpop.permute.xlu0 %773  ;;  %v4638_v57 = vld [vmem:[#allocation36_spill] sm:$0xff] }
 0x151   : > { %4633 = vst [vmem:[#allocation64_spill] sm:$0xff] %v3671_v63  ;;  %v3675_v50 = vsel %vm1379_vm5, %v3499_v25, %v774_v35  ;;  %1158 = vrot.lane.b32.xlu1 %v4635_v38, %s2505_s26  ;;  %v2401_v34 = vld [vmem:[%s2594_s7 + $0x78] sm:$0xff] }
 0x152   : > { %4634 = vst [vmem:[#allocation26_spill] sm:$0xff] %v3675_v50  ;;  %1126 = vrot.lane.b32.xlu0 %v4636_v46, %s2505_s26 }
 0x153   : > { %v3681_v59 = vpop.permute.xlu1 %817 }
 0x154   : > { %v816_v3 = vpop.permute.xlu0 %815 }
 0x155   : > { %1257 = vrot.lane.b32.xlu1 %v4637_v10, %s2506_s14 }
 0x156   : > { %1225 = vrot.lane.b32.xlu0 %v4638_v57, %s2506_s14 }
 0x157   : > { %v3687_v53 = vpop.permute.xlu1 %821 }
 0x158   : > { %v3689_v58 = vpop.permute.xlu0 %819 }
 0x159   : > { %861 = vrot.lane.b32.xlu1 %v4635_v38, %s2502_s11 }
 0x15a   : > { %829 = vrot.lane.b32.xlu0 %v4636_v46, %s2502_s11  ;;  %v2402_v46 = vld [vmem:[%s2594_s7 + $0x80] sm:$0xff] }
 0x15b   : > { %v3695_v25 = vpop.permute.xlu1 %849 }
 0x15c   : > { %v848_v12 = vpop.permute.xlu0 %847 }
 0x15d   : > { %960 = vrot.lane.b32.xlu1 %v4637_v10, %s2503_s12 }
 0x15e   : > { %928 = vrot.lane.b32.xlu0 %v4638_v57, %s2503_s12 }
 0x15f   : > { %v949_v29 = vpop.permute.xlu1 %948 }
 0x160   : > { %v917_v28 = vpop.permute.xlu0 %916 }
 0x161   : > { %1259 = vrot.lane.b32.xlu1 %v4639_v20, %s2506_s14 }
 0x162   : > { %1227 = vrot.lane.b32.xlu0 %v4640_v2, %s2506_s14 }
 0x163   : > { %v3705_v19 = vpop.permute.xlu1 %950 }
 0x164   : > { %v3707_v15 = vpop.permute.xlu0 %918 }
 0x165   : > { %962 = vrot.lane.b32.xlu1 %v4639_v20, %s2503_s12  ;;  %v2403_v20 = vld [vmem:[%s2594_s7] sm:$0xff] }
 0x166   : > { %930 = vrot.lane.b32.xlu0 %v4640_v2, %s2503_s12  ;;  %v4641_v2 = vld [vmem:[#allocation53_spill] sm:$0xff] }
 0x167   : > { %v1047_v26 = vpop.permute.xlu1 %1046 }
 0x168   : > { %v1015_v49 = vpop.permute.xlu0 %1014 }
 0x169   : > { %1058 = vrot.lane.b32.xlu1 %v2869_v60, %s2504_s13  ;;  %v1314_v60 = vsel %vm1313_vm2, %v2403_v20, %v4641_v2 }
 0x16a   : > { %1026 = vrot.lane.b32.xlu0 %v2401_v34, %s2504_s13  ;;  %v4642_v34 = vld [vmem:[#allocation25_spill] sm:$0xff]  ;;  %v1347_v63 = vsel %vm1346_vm3, %v1314_v60, %v4643_v14 }
 0x16b   : > { %v3717_v35 = vpop.permute.xlu1 %1048  ;;  %v3743_v14 = vld [vmem:[%s2594_s7 + $0xc0] sm:$0xff] }
 0x16c   : > { %v3719_v38 = vpop.permute.xlu0 %1016  ;;  %v4645_v60 = vld [vmem:[#allocation61_spill] sm:$0xff] }
 0x16d   : > { %1060 = vrot.lane.b32.xlu1 %v2863_v9, %s2504_s13  ;;  %v4644_v9 = vld [vmem:[#allocation10_spill] sm:$0xff]  ;;  %v1330_v33 = vsel %vm1313_vm2, %v3743_v14, %v4645_v60 }
 0x16e   : > { %1028 = vrot.lane.b32.xlu0 %v2402_v46, %s2504_s13  ;;  %v1380_v46 = vsel %vm1379_vm5, %v1347_v63, %v3507_v45  ;;  %v1363_v63 = vsel %vm1346_vm3, %v1330_v33, %v3380_v54  ;;  %v4647_v54 = vld [vmem:[#allocation9_spill] sm:$0xff] }
 0x16f   : > { %v1149_v10 = vpop.permute.xlu1 %1148  ;;  %v1413_v50 = vsel %vm1412_vm6, %v1380_v46, %v816_v3 }
 0x170   : > { %v1117_v57 = vpop.permute.xlu0 %1116  ;;  %v1446_v2 = vsel %vm1445_vm7, %v1413_v50, %v917_v28  ;;  %v1396_v28 = vsel %vm1379_vm5, %v1363_v63, %v3595_v62 }
 0x171   : > { %1160 = vrot.lane.b32.xlu1 %v4642_v34, %s2505_s26  ;;  %v1479_v45 = vsel %vm1478_vm8, %v1446_v2, %v1015_v49  ;;  %v1429_v49 = vsel %vm1412_vm6, %v1396_v28, %v848_v12  ;;  %v4646_v2 = vld [vmem:[#allocation24_spill] sm:$0xff]  ;;  %v4650_v28 = vld [vmem:[#allocation57_spill] sm:$0xff] }
 0x172   : > { %1128 = vrot.lane.b32.xlu0 %v4644_v9, %s2505_s26  ;;  %v1512_v50 = vsel %vm1511_vm9, %v1479_v45, %v1117_v57  ;;  %v3769_v45 = vld [vmem:[%s2594_s7 + $0xc8] sm:$0xff]  ;;  %v4648_v12 = vld [vmem:[#allocation60_spill] sm:$0xff] }
 0x173   : > { %v1119_v47 = vpop.permute.xlu1 %1118  ;;  %v1331_v63 = vsel %vm1313_vm2, %v3769_v45, %v4648_v12 }
 0x174   : > { %v3737_v20 = vpop.permute.xlu0 %851 }
 0x175   : > { %863 = vrot.lane.b32.xlu1 %v4642_v34, %s2502_s11 }
 0x176   : > { %831 = vrot.lane.b32.xlu0 %v4644_v9, %s2502_s11  ;;  %v1462_v9 = vsel %vm1445_vm7, %v1429_v49, %v949_v29  ;;  %v4652_v49 = vld [vmem:[#allocation66_spill] sm:$0xff] }
 0x177   : > { %v1218_v3 = vpop.permute.xlu1 %1217  ;;  %v1495_v33 = vsel %vm1478_vm8, %v1462_v9, %v1047_v26 }
 0x178   : > { %v1151_v34 = vpop.permute.xlu0 %1150  ;;  %v1545_v46 = vsel %vm1544_vm10, %v1512_v50, %v1218_v3  ;;  %v1528_v62 = vsel %vm1511_vm9, %v1495_v33, %v1149_v10  ;;  %v4649_v50 = vld [vmem:[#allocation52_spill] sm:$0xff]  ;;  %v2406_v3 = vld [vmem:[%s2594_s7 + $0x8] sm:$0xff] }
 0x179   : > { %1162 = vrot.lane.b32.xlu1 %v4646_v2, %s2505_s26  ;;  %2274 = vmatprep.mubr.msk.f32.mxu0 %vm1582_vm11, %v1545_v46  ;;  %v1315_v26 = vsel %vm1313_vm2, %v2406_v3, %v4650_v28  ;;  %v1364_v46 = vsel %vm1346_vm3, %v1331_v63, %v3378_v51  ;;  %v4651_v10 = vld [vmem:[#allocation38_spill] sm:$0xff] }
 0x17a   : > { %1130 = vrot.lane.b32.xlu0 %v4647_v54, %s2505_s26  ;;  %v1348_v9 = vsel %vm1346_vm3, %v1315_v26, %v4652_v49  ;;  %v1397_v33 = vsel %vm1379_vm5, %v1364_v46, %v3593_v21  ;;  %v2408_v49 = vld [vmem:[%s2594_s7 + $0x90] sm:$0xff] }
 0x17b   : > { %v3765_v57 = vpop.permute.xlu1 %853 }
 0x17c   : > { %v1250_v60 = vpop.permute.xlu0 %1249 }
 0x17d   : > { %1261 = vrot.lane.b32.xlu1 %v4649_v50, %s2506_s14  ;;  %v1561_v29 = vsel %vm1544_vm10, %v1528_v62, %v1250_v60  ;;  %v1381_v62 = vsel %vm1379_vm5, %v1348_v9, %v3505_v6  ;;  %v1430_v60 = vsel %vm1412_vm6, %v1397_v33, %v3695_v25 }
 0x17e   : > { %1229 = vrot.lane.b32.xlu0 %v4651_v10, %s2506_s14  ;;  %2298 = vmatprep.mubr.msk.f32.mxu1 %vm1582_vm11, %v1561_v29  ;;  %v1414_v51 = vsel %vm1412_vm6, %v1381_v62, %v3681_v59  ;;  %v1463_v63 = vsel %vm1445_vm7, %v1430_v60, %v3705_v19  ;;  %v2409_v62 = vld [vmem:[%s2594_s7 + $0x158] sm:$0xff] }
 0x17f   : > { %v953_v12 = vpop.permute.xlu1 %952  ;;  %v1447_v21 = vsel %vm1445_vm7, %v1414_v51, %v3707_v15  ;;  %v1496_v29 = vsel %vm1478_vm8, %v1463_v63, %v3717_v35  ;;  %v2410_v60 = vld [vmem:[%s2594_s7 + $0x98] sm:$0xff] }
 0x180   : > { %v921_v3 = vpop.permute.xlu0 %920  ;;  %v1480_v6 = vsel %vm1478_vm8, %v1447_v21, %v3719_v38  ;;  %v1529_v59 = vsel %vm1511_vm9, %v1496_v29, %v1151_v34  ;;  %v4653_v38 = vld [vmem:[#allocation50_spill] sm:$0xff]  ;;  %v4654_v34 = vld [vmem:[#allocation37_spill] sm:$0xff]  ;;  %v3846_v21 = vld [vmem:[%s2594_s7 + $0xd8] sm:$0xff] }
 0x181   : > { %865 = vrot.lane.b32.xlu1 %v4646_v2, %s2502_s11  ;;  %v1513_v19 = vsel %vm1511_vm9, %v1480_v6, %v1119_v47  ;;  %v4655_v29 = vld [vmem:[#allocation63_spill] sm:$0xff] }
 0x182   : > { %833 = vrot.lane.b32.xlu0 %v4647_v54, %s2502_s11  ;;  %v1332_v6 = vsel %vm1313_vm2, %v3846_v21, %v4655_v29 }
 0x183   : > { %v1252_v25 = vpop.permute.xlu1 %1251 }
 0x184   : > { %v1562_v28 = vsel %vm1544_vm10, %v1529_v59, %v1252_v25  ;;  %v1220_v2 = vpop.permute.xlu0 %1219  ;;  %v4656_v59 = vld [vmem:[#allocation29_spill] sm:$0xff]  ;;  %v2412_v25 = vld [vmem:[%s2594_s7 + $0x18] sm:$0xff] }
 0x185   : > { %v1546_v15 = vsel %vm1544_vm10, %v1513_v19, %v1220_v2  ;;  %964 = vrot.lane.b32.xlu1 %v4649_v50, %s2503_s12  ;;  %2299 = vmatmul.mubr.msk.f32.vlgmr.msra.gmra.mrb[0].mxu1 %vm1582_vm11, %v1562_v28  ;;  %v4657_v19 = vld [vmem:[#allocation51_spill] sm:$0xff]  ;;  %v1365_v2 = vsel %vm1346_vm3, %v1332_v6, %v3388_v39 }
 0x186   : > { %932 = vrot.lane.b32.xlu0 %v4651_v10, %s2503_s12  ;;  %2275 = vmatmul.mubr.msk.f32.vlgmr.msra.gmra.mrb[0].mxu0 %vm1582_vm11, %v1546_v15  ;;  %v2407_v10 = vld [vmem:[%s2594_s7 + $0x150] sm:$0xff]  ;;  %v1316_v28 = vsel %vm1313_vm2, %v2412_v25, %v4657_v19  ;;  %v4658_v15 = vld [vmem:[#allocation12_spill] sm:$0xff] }
 0x187   : > { %v3817_v35 = vpop.permute.xlu1 %954 }
 0x188   : > { %v3819_v47 = vpop.permute.xlu0 %922 }
 0x189   : > { %1263 = vrot.lane.b32.xlu1 %v4653_v38, %s2506_s14 }
 0x18a   : > { %1231 = vrot.lane.b32.xlu0 %v4654_v34, %s2506_s14 }
 0x18b   : > { %v1051_v54 = vpop.permute.xlu1 %1050 }
 0x18c   : > { %v1019_v50 = vpop.permute.xlu0 %1018 }
 0x18d   : > { %966 = vrot.lane.b32.xlu1 %v4653_v38, %s2503_s12  ;;  %v4659_v38 = vld [vmem:[#allocation69_spill] sm:$0xff] }
 0x18e   : > { %934 = vrot.lane.b32.xlu0 %v4654_v34, %s2503_s12  ;;  %v1349_v34 = vsel %vm1346_vm3, %v1316_v28, %v4659_v38  ;;  %v4663_v38 = vld [vmem:[#allocation56_spill] sm:$0xff] }
 0x18f   : > { %v3829_v26 = vpop.permute.xlu1 %1052 }
 0x190   : > { %v3831_v46 = vpop.permute.xlu0 %1020 }
 0x191   : > { %1062 = vrot.lane.b32.xlu1 %v2407_v10, %s2504_s13  ;;  %v1398_v10 = vsel %vm1379_vm5, %v1365_v2, %v3603_v17  ;;  %v4662_v2 = vld [vmem:[#allocation62_spill] sm:$0xff] }
 0x192   : > { %1030 = vrot.lane.b32.xlu0 %v2408_v49, %s2504_s13 }
 0x193   : > { %v1153_v9 = vpop.permute.xlu1 %1152 }
 0x194   : > { %v1121_v33 = vpop.permute.xlu0 %1120 }
 0x195   : > { %1064 = vrot.lane.b32.xlu1 %v2409_v62, %s2504_s13  ;;  %v1382_v62 = vsel %vm1379_vm5, %v1349_v34, %v3515_v27  ;;  %v2414_v34 = vld [vmem:[%s2594_s7 + $0x20] sm:$0xff] }
 0x196   : > { %1032 = vrot.lane.b32.xlu0 %v2410_v60, %s2504_s13  ;;  %v1431_v60 = vsel %vm1412_vm6, %v1398_v10, %v3737_v20  ;;  %v1415_v39 = vsel %vm1412_vm6, %v1382_v62, %v3689_v58  ;;  %v4664_v10 = vld [vmem:[#allocation55_spill] sm:$0xff] }
 0x197   : > { %v3841_v51 = vpop.permute.xlu1 %855  ;;  %v1464_v6 = vsel %vm1445_vm7, %v1431_v60, %v953_v12  ;;  %v1448_v25 = vsel %vm1445_vm7, %v1415_v39, %v921_v3  ;;  %v4660_v3 = vld [vmem:[#allocation28_spill] sm:$0xff]  ;;  %v1317_v62 = vsel %vm1313_vm2, %v2414_v34, %v4664_v10  ;;  %v2415_v34 = vld [vmem:[%s2594_s7 + $0x168] sm:$0xff] }
 0x198   : > { %v3843_v63 = vpop.permute.xlu0 %823  ;;  %v1497_v17 = vsel %vm1478_vm8, %v1464_v6, %v1051_v54  ;;  %v1481_v27 = vsel %vm1478_vm8, %v1448_v25, %v1019_v50  ;;  %v4661_v54 = vld [vmem:[#allocation11_spill] sm:$0xff]  ;;  %v4665_v39 = vld [vmem:[#allocation40_spill] sm:$0xff]  ;;  %v2416_v10 = vld [vmem:[%s2594_s7 + $0xa8] sm:$0xff] }
 0x199   : > { %1164 = vrot.lane.b32.xlu1 %v4656_v59, %s2505_s26  ;;  %v1530_v20 = vsel %vm1511_vm9, %v1497_v17, %v1153_v9  ;;  %v1514_v58 = vsel %vm1511_vm9, %v1481_v27, %v1121_v33  ;;  %v3893_v33 = vld [vmem:[%s2594_s7 + $0xe0] sm:$0xff]  ;;  %v4666_v6 = vld [vmem:[#allocation68_spill] sm:$0xff] }
 0x19a   : > { %1132 = vrot.lane.b32.xlu0 %v4658_v15, %s2505_s26  ;;  %v1350_v25 = vsel %vm1346_vm3, %v1317_v62, %v4666_v6  ;;  %v2418_v6 = vld [vmem:[%s2594_s7 + $0xb0] sm:$0xff] }
 0x19b   : > { %v1155_v49 = vpop.permute.xlu1 %1154 }
 0x19c   : > { %v1123_v29 = vpop.permute.xlu0 %1122 }
 0x19d   : > { %867 = vrot.lane.b32.xlu1 %v4656_v59, %s2502_s11 }
 0x19e   : > { %835 = vrot.lane.b32.xlu0 %v4658_v15, %s2502_s11  ;;  %v1333_v15 = vsel %vm1313_vm2, %v3893_v33, %v4662_v2 }
 0x19f   : > { %v1254_v19 = vpop.permute.xlu1 %1253  ;;  %v1366_v60 = vsel %vm1346_vm3, %v1333_v15, %v3386_v56 }
 0x1a0   : > { %v1563_v12 = vsel %vm1544_vm10, %v1530_v20, %v1254_v19  ;;  %v1222_v28 = vpop.permute.xlu0 %1221  ;;  %v1399_v17 = vsel %vm1379_vm5, %v1366_v60, %v3601_v1  ;;  %v1383_v20 = vsel %vm1379_vm5, %v1350_v25, %v3513_v31 }
 0x1a1   : > { %v1547_v59 = vsel %vm1544_vm10, %v1514_v58, %v1222_v28  ;;  %1166 = vrot.lane.b32.xlu1 %v4660_v3, %s2505_s26  ;;  %2301 = vmatprep.mubr.msk.f32.mxu1 %vm1582_vm11, %v1563_v12  ;;  %v1432_v19 = vsel %vm1412_vm6, %v1399_v17, %v3765_v57  ;;  %v1416_v56 = vsel %vm1412_vm6, %v1383_v20, %v3687_v53  ;;  %v4669_v20 = vld [vmem:[#allocation31_spill] sm:$0xff] }
 0x1a2   : > { %1134 = vrot.lane.b32.xlu0 %v4661_v54, %s2505_s26  ;;  %2277 = vmatprep.mubr.msk.f32.mxu0 %vm1582_vm11, %v1547_v59  ;;  %v1465_v12 = vsel %vm1445_vm7, %v1432_v19, %v3817_v35  ;;  %v1449_v1 = vsel %vm1445_vm7, %v1416_v56, %v3819_v47  ;;  %v4670_v19 = vld [vmem:[#allocation14_spill] sm:$0xff] }
 0x1a3   : > { %v3888_v50 = vpop.permute.xlu1 %857  ;;  %v1498_v28 = vsel %vm1478_vm8, %v1465_v12, %v3829_v26  ;;  %v1482_v31 = vsel %vm1478_vm8, %v1449_v1, %v3831_v46  ;;  %v1433_v12 = vsel %vm1412_vm6, %v3615_v0, %v3841_v51 }
 0x1a4   : > { %v3890_v9 = vpop.permute.xlu0 %825  ;;  %v1531_v53 = vsel %vm1511_vm9, %v1498_v28, %v1155_v49  ;;  %v1515_v35 = vsel %vm1511_vm9, %v1482_v31, %v1123_v29  ;;  %v4667_v49 = vld [vmem:[#allocation54_spill] sm:$0xff]  ;;  %v4668_v29 = vld [vmem:[#allocation39_spill] sm:$0xff]  ;;  %v1417_v28 = vsel %vm1412_vm6, %v3527_v37, %v3843_v63 }
 0x1a5   : > { %1265 = vrot.lane.b32.xlu1 %v4663_v38, %s2506_s14 }
 0x1a6   : > { %1233 = vrot.lane.b32.xlu0 %v4665_v39, %s2506_s14 }
 0x1a7   : > { %v957_v27 = vpop.permute.xlu1 %956 }
 0x1a8   : > { %v925_v58 = vpop.permute.xlu0 %924  ;;  %v1466_v31 = vsel %vm1445_vm7, %v1433_v12, %v957_v27 }
 0x1a9   : > { %869 = vrot.lane.b32.xlu1 %v4660_v3, %s2502_s11 }
 0x1aa   : > { %837 = vrot.lane.b32.xlu0 %v4661_v54, %s2502_s11 }
 0x1ab   : > { %v1256_v57 = vpop.permute.xlu1 %1255 }
 0x1ac   : > { %v1564_v59 = vsel %vm1544_vm10, %v1531_v53, %v1256_v57  ;;  %v1224_v3 = vpop.permute.xlu0 %1223  ;;  %v1450_v53 = vsel %vm1445_vm7, %v1417_v28, %v925_v58  ;;  %v4672_v58 = vld [vmem:[#allocation13_spill] sm:$0xff] }
 0x1ad   : > { %v1548_v47 = vsel %vm1544_vm10, %v1515_v35, %v1224_v3  ;;  %968 = vrot.lane.b32.xlu1 %v4663_v38, %s2503_s12  ;;  %2302 = vmatmul.mubr.msk.f32.gmra.mrb[2].mxu1 %vm1582_vm11, %v1564_v59  ;;  %v4671_v3 = vld [vmem:[#allocation30_spill] sm:$0xff] }
 0x1ae   : > { %936 = vrot.lane.b32.xlu0 %v4665_v39, %s2503_s12  ;;  %2278 = vmatmul.mubr.msk.f32.gmra.mrb[2].mxu0 %vm1582_vm11, %v1548_v47  ;;  %v2417_v39 = vld [vmem:[%s2594_s7 + $0x170] sm:$0xff] }
 0x1af   : > { %v959_v26 = vpop.permute.xlu1 %958 }
 0x1b0   : > { %v927_v46 = vpop.permute.xlu0 %926 }
 0x1b1   : > { %1267 = vrot.lane.b32.xlu1 %v4667_v49, %s2506_s14 }
 0x1b2   : > { %1235 = vrot.lane.b32.xlu0 %v4668_v29, %s2506_s14 }
 0x1b3   : > { %v1055_v54 = vpop.permute.xlu1 %1054 }
 0x1b4   : > { %v1023_v2 = vpop.permute.xlu0 %1022  ;;  %v1499_v57 = vsel %vm1478_vm8, %v1466_v31, %v1055_v54  ;;  %v4674_v54 = vld [vmem:[#allocation42_spill] sm:$0xff] }
 0x1b5   : > { %970 = vrot.lane.b32.xlu1 %v4667_v49, %s2503_s12  ;;  %v1483_v35 = vsel %vm1478_vm8, %v1450_v53, %v1023_v2  ;;  %v811_v53 = vrot.slane %v3277_v4, 1 }
 0x1b6   : > { %938 = vrot.lane.b32.xlu0 %v4668_v29, %s2503_s12  ;;  %v4673_v29 = vld [vmem:[#allocation59_spill] sm:$0xff] }
 0x1b7   : > { %v1057_v15 = vpop.permute.xlu1 %1056 }
 0x1b8   : > { %v1025_v38 = vpop.permute.xlu0 %1024 }
 0x1b9   : > { %1066 = vrot.lane.b32.xlu1 %v2415_v34, %s2504_s13  ;;  %v1434_v34 = vsel %vm1412_vm6, %v3611_v8, %v3888_v50 }
 0x1ba   : > { %1034 = vrot.lane.b32.xlu0 %v2416_v10, %s2504_s13 }
 0x1bb   : > { %v1157_v62 = vpop.permute.xlu1 %1156 }
 0x1bc   : > { %v1125_v60 = vpop.permute.xlu0 %1124  ;;  %v1532_v0 = vsel %vm1511_vm9, %v1499_v57, %v1157_v62  ;;  %v1418_v62 = vsel %vm1412_vm6, %v3523_v11, %v3890_v9  ;;  %v810_v57 = vrot.slane %v3283_v5, 1 }
 0x1bd   : > { %1068 = vrot.lane.b32.xlu1 %v2417_v39, %s2504_s13  ;;  %v1516_v59 = vsel %vm1511_vm9, %v1483_v35, %v1125_v60  ;;  %v1467_v60 = vsel %vm1445_vm7, %v1434_v34, %v959_v26  ;;  %v1451_v39 = vsel %vm1445_vm7, %v1418_v62, %v927_v46  ;;  %v911_v62 = vrot.slane %v3283_v5, 2 }
 0x1be   : > { %1036 = vrot.lane.b32.xlu0 %v2418_v6, %s2504_s13  ;;  %v1500_v6 = vsel %vm1478_vm8, %v1467_v60, %v1057_v15 }
 0x1bf   : > { %v3955_v25 = vpop.permute.xlu1 %859 }
 0x1c0   : > { %v3957_v17 = vpop.permute.xlu0 %827 }
 0x1c1   : > { %1168 = vrot.lane.b32.xlu1 %v4669_v20, %s2505_s26 }
 0x1c2   : > { %1136 = vrot.lane.b32.xlu0 %v4670_v19, %s2505_s26 }
 0x1c3   : > { %v1159_v56 = vpop.permute.xlu1 %1158 }
 0x1c4   : > { %v1127_v1 = vpop.permute.xlu0 %1126  ;;  %v1533_v8 = vsel %vm1511_vm9, %v1500_v6, %v1159_v56  ;;  %v4676_v56 = vld [vmem:[#allocation41_spill] sm:$0xff] }
 0x1c5   : > { %871 = vrot.lane.b32.xlu1 %v4669_v20, %s2502_s11  ;;  %v1484_v20 = vsel %vm1478_vm8, %v1451_v39, %v1025_v38  ;;  %v4675_v38 = vld [vmem:[#allocation58_spill] sm:$0xff] }
 0x1c6   : > { %839 = vrot.lane.b32.xlu0 %v4670_v19, %s2502_s11  ;;  %v1517_v19 = vsel %vm1511_vm9, %v1484_v20, %v1127_v1 }
 0x1c7   : > { %v1258_v51 = vpop.permute.xlu1 %1257 }
 0x1c8   : > { %v1565_v37 = vsel %vm1544_vm10, %v1532_v0, %v1258_v51  ;;  %v1226_v63 = vpop.permute.xlu0 %1225  ;;  %v812_v51 = vsel %vm357_vm0, %v810_v57, %v811_v53 }
 0x1c9   : > { %v1549_v27 = vsel %vm1544_vm10, %v1516_v59, %v1226_v63  ;;  %1170 = vrot.lane.b32.xlu1 %v4671_v3, %s2505_s26  ;;  %2304 = vmatprep.mubr.msk.f32.mxu1 %vm1582_vm11, %v1565_v37  ;;  %v305_v37 = vld [vmem:[%s2594_s7 + $0x190] sm:$0x3] }
 0x1ca   : > { %1138 = vrot.lane.b32.xlu0 %v4672_v58, %s2505_s26  ;;  %2280 = vmatprep.mubr.msk.f32.mxu0 %vm1582_vm11, %v1549_v27  ;;  %v4677_v27 = vld [vmem:[#allocation16_spill] sm:$0xff] }
 0x1cb   : > { %v3987_v47 = vpop.permute.xlu1 %861 }
 0x1cc   : > { %v3989_v49 = vpop.permute.xlu0 %829 }
 0x1cd   : > { %1269 = vrot.lane.b32.xlu1 %v4673_v29, %s2506_s14 }
 0x1ce   : > { %1237 = vrot.lane.b32.xlu0 %v4674_v54, %s2506_s14 }
 0x1cf   : > { %v961_v2 = vpop.permute.xlu1 %960 }
 0x1d0   : > { %v929_v10 = vpop.permute.xlu0 %928 }
 0x1d1   : > { %873 = vrot.lane.b32.xlu1 %v4671_v3, %s2502_s11 }
 0x1d2   : > { %841 = vrot.lane.b32.xlu0 %v4672_v58, %s2502_s11  ;;  %v1435_v58 = vsel %vm1412_vm6, %v3627_v52, %v3955_v25 }
 0x1d3   : > { %v1260_v50 = vpop.permute.xlu1 %1259  ;;  %v1468_v34 = vsel %vm1445_vm7, %v1435_v58, %v961_v2 }
 0x1d4   : > { %v1566_v11 = vsel %vm1544_vm10, %v1533_v8, %v1260_v50  ;;  %v1228_v9 = vpop.permute.xlu0 %1227 }
 0x1d5   : > { %v1550_v26 = vsel %vm1544_vm10, %v1517_v19, %v1228_v9  ;;  %972 = vrot.lane.b32.xlu1 %v4673_v29, %s2503_s12  ;;  %2305 = vmatmul.mubr.msk.f32.gmra.mrb[4].mxu1 %vm1582_vm11, %v1566_v11  ;;  %v4679_v19 = vld [vmem:[#allocation44_spill] sm:$0xff]  ;;  %v1436_v9 = vsel %vm1412_vm6, %v3623_v16, %v3987_v47 }
 0x1d6   : > { %940 = vrot.lane.b32.xlu0 %v4674_v54, %s2503_s12  ;;  %2281 = vmatmul.mubr.msk.f32.gmra.mrb[4].mxu0 %vm1582_vm11, %v1550_v26  ;;  %v1419_v54 = vsel %vm1412_vm6, %v3539_v43, %v3957_v17 }
 0x1d7   : > { %v963_v46 = vpop.permute.xlu1 %962  ;;  %v1452_v60 = vsel %vm1445_vm7, %v1419_v54, %v929_v10  ;;  %v4678_v10 = vld [vmem:[#allocation15_spill] sm:$0xff] }
 0x1d8   : > { %v931_v15 = vpop.permute.xlu0 %930 }
 0x1d9   : > { %1271 = vrot.lane.b32.xlu1 %v4675_v38, %s2506_s14 }
 0x1da   : > { %1239 = vrot.lane.b32.xlu0 %v4676_v56, %s2506_s14 }
 0x1db   : > { %v1059_v12 = vpop.permute.xlu1 %1058 }
 0x1dc   : > { %v1027_v1 = vpop.permute.xlu0 %1026  ;;  %v1501_v39 = vsel %vm1478_vm8, %v1468_v34, %v1059_v12  ;;  %v308_v34 = vld [vmem:[%s2594_s7 + $0x1a8] sm:$0x3] }
 0x1dd   : > { %974 = vrot.lane.b32.xlu1 %v4675_v38, %s2503_s12  ;;  %v1420_v38 = vsel %vm1412_vm6, %v3535_v24, %v3989_v49 }
 0x1de   : > { %942 = vrot.lane.b32.xlu0 %v4676_v56, %s2503_s12  ;;  %v1469_v56 = vsel %vm1445_vm7, %v1436_v9, %v963_v46  ;;  %v1453_v12 = vsel %vm1445_vm7, %v1420_v38, %v931_v15 }
 0x1df   : > { %v1061_v28 = vpop.permute.xlu1 %1060 }
 0x1e0   : > { %v1029_v31 = vpop.permute.xlu0 %1028 }
 0x1e1   : > { %1070 = vrot.lane.b32.xlu1 %v3283_v5, %s2504_s13  ;;  %v1486_v57 = vsel %vm1478_vm8, %v1453_v12, %v1029_v31 }
 0x1e2   : > { %1038 = vrot.lane.b32.xlu0 %v3743_v14, %s2504_s13  ;;  %v813_v14 = vrot.slane %v305_v37, 1 }
 0x1e3   : > { %v1161_v35 = vpop.permute.xlu1 %1160 }
 0x1e4   : > { %v1129_v0 = vpop.permute.xlu0 %1128  ;;  %v814_v52 = vsel %vm357_vm0, %v811_v53, %v813_v14  ;;  %v1534_v25 = vsel %vm1511_vm9, %v1501_v39, %v1161_v35  ;;  %v914_v53 = vrot.slane %v305_v37, 2  ;;  %v1114_v39 = vrot.slane %v308_v34, 1 }
 0x1e5   : > { %1072 = vrot.lane.b32.xlu1 %v3277_v4, %s2504_s13 }
 0x1e6   : > { %1040 = vrot.lane.b32.xlu0 %v3769_v45, %s2504_s13  ;;  %v912_v45 = vrot.slane %v3277_v4, 2  ;;  %v1485_v4 = vsel %vm1478_vm8, %v1452_v60, %v1027_v1  ;;  %v1502_v1 = vsel %vm1478_vm8, %v1469_v56, %v1061_v28 }
 0x1e7   : > { %v4038_v59 = vpop.permute.xlu1 %863  ;;  %v1518_v17 = vsel %vm1511_vm9, %v1485_v4, %v1129_v0  ;;  %v4680_v0 = vld [vmem:[#allocation43_spill] sm:$0xff] }
 0x1e8   : > { %v4041_v63 = vpop.permute.xlu0 %831  ;;  %v913_v20 = vsel %vm534_vm1, %v911_v62, %v912_v45  ;;  %v915_v15 = vsel %vm534_vm1, %v912_v45, %v914_v53 }
 0x1e9   : > { %1172 = vrot.lane.b32.xlu1 %v812_v51, %s2505_s26 }
 0x1ea   : > { %1140 = vrot.lane.b32.xlu0 %v4677_v27, %s2505_s26 }
 0x1eb   : > { %v1163_v3 = vpop.permute.xlu1 %1162 }
 0x1ec   : > { %v1131_v29 = vpop.permute.xlu0 %1130  ;;  %v1535_v16 = vsel %vm1511_vm9, %v1502_v1, %v1163_v3  ;;  %v307_v3 = vld [vmem:[%s2594_s7 + $0x1a0] sm:$0xff] }
 0x1ed   : > { %875 = vrot.lane.b32.xlu1 %v812_v51, %s2502_s11  ;;  %v1519_v35 = vsel %vm1511_vm9, %v1486_v57, %v1131_v29  ;;  %v1112_v45 = vrot.slane %v307_v3, 1 }
 0x1ee   : > { %843 = vrot.lane.b32.xlu0 %v4677_v27, %s2502_s11  ;;  %v306_v27 = vld [vmem:[%s2594_s7 + $0x198] sm:$0xff]  ;;  %s237_s7 = sand.u32 1, %s2481_s16  }
 0x1ef   : > { %v1262_v43 = vpop.permute.xlu1 %1261  ;;  %v1111_v29 = vrot.slane %v306_v27, 1  ;;  %s2184_s22 = sshll.u32 %s237_s7, 8 }
 0x1f0   : > { %v1567_v2 = vsel %vm1544_vm10, %v1534_v25, %v1262_v43  ;;  %v1230_v6 = vpop.permute.xlu0 %1229  ;;  %v1212_v25 = vrot.slane %v306_v27, 2  ;;  %v1213_v43 = vrot.slane %v307_v3, 2  ;;  %s4225_s24 = scalar_lea.vmem [#allocation2], %s2184_s22 }
 0x1f1   : > { %v1551_v5 = vsel %vm1544_vm10, %v1518_v17, %v1230_v6  ;;  %1174 = vrot.lane.b32.xlu1 %v814_v52, %s2505_s26  ;;  %2307 = vmatprep.mubr.msk.f32.mxu1 %vm1582_vm11, %v1567_v2  ;;  %v1113_v60 = vsel %vm357_vm0, %v1111_v29, %v1112_v45  ;;  %v1421_v6 = vsel %vm1412_vm6, %v3551_v13, %v4041_v63  ;;  %s2065_s29 = sshll.u32 %s4225_s24, 4  ;;  %s4385_s29 = int_to_ptr.vmem [resolvable:$true] %s2065_s29 }
 0x1f2   : > { %1142 = vrot.lane.b32.xlu0 %v4678_v10, %s2505_s26  ;;  %2283 = vmatprep.mubr.msk.f32.mxu0 %vm1582_vm11, %v1551_v5  ;;  %s2419_s8 = scalar_lea.vmem %s4385_s29, 4096 }
 0x1f3   : > { %v4072_v8 = vpop.permute.xlu1 %865  ;;  %p2420_p12 = scmp.ne.s32.totalorder %s4385_s29, %s2419_s8 }
 0x1f4   : > { %v4074_v50 = vpop.permute.xlu0 %833  ;;  %v1438_v1 = vsel %vm1412_vm6, %v3635_v23, %v4072_v8 }
 0x1f5   : > { %1273 = vrot.lane.b32.xlu1 %v913_v20, %s2506_s14  ;;  %p2421_p13 = pnand %p2420_p12, %p2574_p4 }
 0x1f6   : > { %1241 = vrot.lane.b32.xlu0 %v4679_v19, %s2506_s14 }
 0x1f7   : > { %v965_v11 = vpop.permute.xlu1 %964  ;;  %p2422_p0 = pneg %p2421_p13 }
 0x1f8   : > { %v933_v26 = vpop.permute.xlu0 %932 }
 0x1f9   : > { %877 = vrot.lane.b32.xlu1 %v814_v52, %s2502_s11 }
 0x1fa   : > { %845 = vrot.lane.b32.xlu0 %v4678_v10, %s2502_s11  ;;  %v1454_v10 = vsel %vm1445_vm7, %v1421_v6, %v933_v26 }
 0x1fb   : > { %v1264_v47 = vpop.permute.xlu1 %1263 }
 0x1fc   : > { %v1568_v24 = vsel %vm1544_vm10, %v1535_v16, %v1264_v47  ;;  %v1232_v49 = vpop.permute.xlu0 %1231 }
 0x1fd   : > { %v1552_v46 = vsel %vm1544_vm10, %v1519_v35, %v1232_v49  ;;  %976 = vrot.lane.b32.xlu1 %v913_v20, %s2503_s12  ;;  %2308 = vmatmul.mubr.msk.f32.gmra.mrb[6].mxu1 %vm1582_vm11, %v1568_v24  ;;  %v1214_v20 = vsel %vm534_vm1, %v1212_v25, %v1213_v43 }
 0x1fe   : > { %944 = vrot.lane.b32.xlu0 %v4679_v19, %s2503_s12  ;;  %2284 = vmatmul.mubr.msk.f32.gmra.mrb[6].mxu0 %vm1582_vm11, %v1552_v46  ;;  %v1215_v19 = vrot.slane %v308_v34, 2 }
 0x1ff   : > { %v967_v28 = vpop.permute.xlu1 %966 }
 0x200   : > { %v935_v31 = vpop.permute.xlu0 %934  ;;  %v1471_v57 = vsel %vm1445_vm7, %v1438_v1, %v967_v28 }
 0x201   : > { %1275 = vrot.lane.b32.xlu1 %v915_v15, %s2506_s14 }
 0x202   : > { %1243 = vrot.lane.b32.xlu0 %v4680_v0, %s2506_s14 }
 0x203   : > { %v1063_v51 = vpop.permute.xlu1 %1062 }
 0x204   : > { %v1031_v37 = vpop.permute.xlu0 %1030 }
 0x205   : > { %978 = vrot.lane.b32.xlu1 %v915_v15, %s2503_s12 }
 0x206   : > { %946 = vrot.lane.b32.xlu0 %v4680_v0, %s2503_s12 }
 0x207   : > { %v1065_v14 = vpop.permute.xlu1 %1064 }
 0x208   : > { %v1033_v58 = vpop.permute.xlu0 %1032  ;;  %v1504_v47 = vsel %vm1478_vm8, %v1471_v57, %v1065_v14 }
 0x209   : > { %1074 = vrot.lane.b32.xlu1 %v306_v27, %s2504_s13 }
 0x20a   : > { %1042 = vrot.lane.b32.xlu0 %v3846_v21, %s2504_s13  ;;  %v1115_v21 = vsel %vm357_vm0, %v1112_v45, %v1114_v39 }
 0x20b   : > { %v1165_v54 = vpop.permute.xlu1 %1164 }
 0x20c   : > { %v1133_v62 = vpop.permute.xlu0 %1132 }
 0x20d   : > { %1076 = vrot.lane.b32.xlu1 %v307_v3, %s2504_s13 }
 0x20e   : > { %1044 = vrot.lane.b32.xlu0 %v3893_v33, %s2504_s13  ;;  %v1437_v33 = vsel %vm1412_vm6, %v3639_v48, %v4038_v59  ;;  %v1487_v48 = vsel %vm1478_vm8, %v1454_v10, %v1031_v37 }
 0x20f   : > { %v868_v52 = vpop.permute.xlu1 %867  ;;  %v1470_v5 = vsel %vm1445_vm7, %v1437_v33, %v965_v11  ;;  %v1520_v13 = vsel %vm1511_vm9, %v1487_v48, %v1133_v62 }
 0x210   : > { %v4118_v4 = vpop.permute.xlu0 %835 }
 0x211   : > { %1176 = vrot.lane.b32.xlu1 %v1113_v60, %s2505_s26  ;;  %v1423_v45 = vsel %vm1412_vm6, %v3563_v55, %v4118_v4 }
 0x212   : > { %1144 = vrot.lane.b32.xlu0 %v4611_v36, %s2505_s26  ;;  %v1503_v36 = vsel %vm1478_vm8, %v1470_v5, %v1063_v51 }
 0x213   : > { %v1167_v17 = vpop.permute.xlu1 %1166  ;;  %v1536_v59 = vsel %vm1511_vm9, %v1503_v36, %v1165_v54 }
 0x214   : > { %v1135_v2 = vpop.permute.xlu0 %1134 }
 0x215   : > { %1178 = vrot.lane.b32.xlu1 %v1115_v21, %s2505_s26 }
 0x216   : > { %1146 = vrot.lane.b32.xlu0 %v2810_v42, %s2505_s26  ;;  %v1216_v42 = vsel %vm534_vm1, %v1213_v43, %v1215_v19  ;;  %s2226_s26 = sshll.u32 %s2489_s18, 12  ;;  %s4392_s18 = scalar_lea.sflag [#allocation3], %s237_s7 }
 0x217   : > { %v1266_v9 = vpop.permute.xlu1 %1265  ;;  %s4382_s6 = scalar_lea.hbm %s4443_s4, %s2226_s26 }
 0x218   : > { %v1569_v63 = vsel %vm1544_vm10, %v1536_v59, %v1266_v9  ;;  %v1234_v11 = vpop.permute.xlu0 %1233 }
 0x219   : > { %v1553_v26 = vsel %vm1544_vm10, %v1520_v13, %v1234_v11  ;;  %1277 = vrot.lane.b32.xlu1 %v1214_v20, %s2506_s14  ;;  %2310 = vmatprep.mubr.msk.f32.mxu1 %vm1582_vm11, %v1569_v63 }
 0x21a   : > { %1245 = vrot.lane.b32.xlu0 %v3062_v18, %s2506_s14  ;;  %2286 = vmatprep.mubr.msk.f32.mxu0 %vm1582_vm11, %v1553_v26  ;;  %v1422_v18 = vsel %vm1412_vm6, %v3547_v22, %v4074_v50 }
 0x21b   : > { %v870_v38 = vpop.permute.xlu1 %869  ;;  %v1455_v16 = vsel %vm1445_vm7, %v1422_v18, %v935_v31 }
 0x21c   : > { %v838_v56 = vpop.permute.xlu0 %837  ;;  %v1488_v35 = vsel %vm1478_vm8, %v1455_v16, %v1033_v58  ;;  %v1439_v58 = vsel %vm1412_vm6, %v3651_v61, %v868_v52  ;;  %v1440_v33 = vsel %vm1412_vm6, %v3647_v32, %v870_v38 }
 0x21d   : > { %1279 = vrot.lane.b32.xlu1 %v1216_v42, %s2506_s14  ;;  %v1521_v49 = vsel %vm1511_vm9, %v1488_v35, %v1135_v2  ;;  %v1424_v6 = vsel %vm1412_vm6, %v3559_v41, %v838_v56  ;;  %v4208_v42 = vld [vmem:[%s4441_s2] ss:$0 sm:$0xff] }
 0x21e   : > { %1247 = vrot.lane.b32.xlu0 %v3057_v7, %s2506_s14  ;;  %v1537_v7 = vsel %vm1511_vm9, %v1504_v47, %v1167_v17  ;;  %s2423_s14 = sshll.u32 %s2507_s10, 4  ;;  %s2424_s14 = int_to_ptr.vmem [resolvable:$false] %s2423_s14 }
 0x21f   : > { %v969_v12 = vpop.permute.xlu1 %968  ;;  %s2425_s11 = scalar_lea.vmem %s2424_s14, 8192  ;;  %p2426_p1 = scmp.lt.s32.totalorder %s4385_s29, %s2424_s14 }
 0x220   : > { %v937_v53 = vpop.permute.xlu0 %936  ;;  %v1472_v54 = vsel %vm1445_vm7, %v1439_v58, %v969_v12  ;;  %v4213_v12 = vld [vmem:[%s4442_s3] ss:$0 sm:$0xff]  ;;  %p2427_p2 = scmp.lt.s32.totalorder %s2425_s11, %s2419_s8 }
 0x221   : > { %v1456_v34 = vsel %vm1445_vm7, %v1423_v45, %v937_v53 }
 0x222   : > { %p2428_p3 = por %p2427_p2, %p2426_p1 }
 0x223   : > { %v1268_v24 = vpop.permute.xlu1 %1267 }
 0x224   : > { %v1570_v23 = vsel %vm1544_vm10, %v1537_v7, %v1268_v24  ;;  %v1236_v8 = vpop.permute.xlu0 %1235  ;;  %p2429_p5 = pnand %p2428_p3, %p2422_p0 }
 0x225   : > { %v1554_v46 = vsel %vm1544_vm10, %v1521_v49, %v1236_v8  ;;  %2311 = vmatmul.mubr.msk.f32.gmra.mrb[8].mxu1 %vm1582_vm11, %v1570_v23 }
 0x226   : > { %2287 = vmatmul.mubr.msk.f32.gmra.mrb[8].mxu0 %vm1582_vm11, %v1554_v46 }
 0x227   : > { %v971_v22 = vpop.permute.xlu1 %970 }
 0x228   : > { %v939_v50 = vpop.permute.xlu0 %938  ;;  %v1473_v5 = vsel %vm1445_vm7, %v1440_v33, %v971_v22 }
 0x229   : > { %v1457_v10 = vsel %vm1445_vm7, %v1424_v6, %v939_v50 }
 0x22b   : > { %v1067_v15 = vpop.permute.xlu1 %1066 }
 0x22c   : > { %v1035_v28 = vpop.permute.xlu0 %1034  ;;  %v1505_v62 = vsel %vm1478_vm8, %v1472_v54, %v1067_v15 }
 0x22d   : > { %v1489_v60 = vsel %vm1478_vm8, %v1456_v34, %v1035_v28 }
 0x22f   : > { %v1069_v31 = vpop.permute.xlu1 %1068 }
 0x230   : > { %v1037_v0 = vpop.permute.xlu0 %1036  ;;  %v1506_v36 = vsel %vm1478_vm8, %v1473_v5, %v1069_v31 }
 0x231   : > { %v1490_v20 = vsel %vm1478_vm8, %v1457_v10, %v1037_v0 }
 0x233   : > { %v1169_v51 = vpop.permute.xlu1 %1168 }
 0x234   : > { %v1137_v37 = vpop.permute.xlu0 %1136  ;;  %v1538_v39 = vsel %vm1511_vm9, %v1505_v62, %v1169_v51 }
 0x235   : > { %v1522_v43 = vsel %vm1511_vm9, %v1489_v60, %v1137_v37 }
 0x237   : > { %v4167_v27 = vpop.permute.xlu1 %871 }
 0x238   : > { %v4169_v14 = vpop.permute.xlu0 %839 }
 0x23b   : > { %v1171_v3 = vpop.permute.xlu1 %1170 }
 0x23c   : > { %v1139_v29 = vpop.permute.xlu0 %1138  ;;  %v1539_v19 = vsel %vm1511_vm9, %v1506_v36, %v1171_v3  ;;  %v1441_v3 = vsel %vm1412_vm6, %v3663_v40, %v4167_v27 }
 0x23d   : > { %v1523_v59 = vsel %vm1511_vm9, %v1490_v20, %v1139_v29  ;;  %v1425_v29 = vsel %vm1412_vm6, %v3575_v44, %v4169_v14 }
 0x23f   : > { %v1270_v25 = vpop.permute.xlu1 %1269 }
 0x240   : > { %v1571_v61 = vsel %vm1544_vm10, %v1538_v39, %v1270_v25  ;;  %v1238_v52 = vpop.permute.xlu0 %1237 }
 0x241   : > { %v1555_v21 = vsel %vm1544_vm10, %v1522_v43, %v1238_v52  ;;  %2313 = vmatprep.mubr.msk.f32.mxu1 %vm1582_vm11, %v1571_v61 }
 0x242   : > { %2289 = vmatprep.mubr.msk.f32.mxu0 %vm1582_vm11, %v1555_v21 }
 0x243   : > { %v4186_v55 = vpop.permute.xlu1 %873 }
 0x244   : > { %v4188_v4 = vpop.permute.xlu0 %841  ;;  %v1442_v52 = vsel %vm1412_vm6, %v3659_v30, %v4186_v55 }
 0x247   : > { %v973_v17 = vpop.permute.xlu1 %972 }
 0x248   : > { %v941_v2 = vpop.permute.xlu0 %940  ;;  %v1474_v45 = vsel %vm1445_vm7, %v1441_v3, %v973_v17  ;;  %v4681_v17 = vld [vmem:[#allocation17_spill] sm:$0xff] }
 0x249   : > { %v1458_v54 = vsel %vm1445_vm7, %v1425_v29, %v941_v2  ;;  %v1426_v33 = vsel %vm1412_vm6, %v4681_v17, %v4188_v4 }
 0x24b   : > { %v1272_v48 = vpop.permute.xlu1 %1271 }
 0x24c   : > { %v1572_v32 = vsel %vm1544_vm10, %v1539_v19, %v1272_v48  ;;  %v1240_v9 = vpop.permute.xlu0 %1239 }
 0x24d   : > { %v1556_v41 = vsel %vm1544_vm10, %v1523_v59, %v1240_v9  ;;  %2314 = vmatmul.mubr.msk.f32.gmra.mrb[10].mxu1 %vm1582_vm11, %v1572_v32 }
 0x24e   : > { %2290 = vmatmul.mubr.msk.f32.gmra.mrb[10].mxu0 %vm1582_vm11, %v1556_v41 }
 0x24f   : > { %v975_v13 = vpop.permute.xlu1 %974 }
 0x250   : > { %v943_v63 = vpop.permute.xlu0 %942  ;;  %v1475_v2 = vsel %vm1445_vm7, %v1442_v52, %v975_v13 }
 0x251   : > { %v1459_v6 = vsel %vm1445_vm7, %v1426_v33, %v943_v63 }
 0x253   : > { %v1071_v11 = vpop.permute.xlu1 %1070 }
 0x254   : > { %v1039_v26 = vpop.permute.xlu0 %1038  ;;  %v1507_v34 = vsel %vm1478_vm8, %v1474_v45, %v1071_v11 }
 0x255   : > { %v1491_v62 = vsel %vm1478_vm8, %v1458_v54, %v1039_v26 }
 0x257   : > { %v1073_v38 = vpop.permute.xlu1 %1072 }
 0x258   : > { %v1041_v56 = vpop.permute.xlu0 %1040  ;;  %v2300_v1 = vpop.f32.mrb[0].mxu1  ;;  %v1508_v5 = vsel %vm1478_vm8, %v1475_v2, %v1073_v38 }
 0x259   : > { %v2276_v53 = vpop.f32.mrb[0].mxu0  ;;  %v1932_v18 = vmul.f32 %v2300_v1, %v4208_v42  ;;  %v1829_v57 = vpop.f32.mrb[1].mxu1  ;;  %v1492_v10 = vsel %vm1478_vm8, %v1459_v6, %v1041_v56 }
 0x25a   : > { %v1916_v16 = vmul.f32 %v2276_v53, %v4208_v42  ;;  %v1749_v47 = vpop.f32.mrb[1].mxu0  ;;  %v1931_v35 = vmul.f32 %v4208_v42, %v1829_v57 }
 0x25b   : > { %v1971_v7 = vadd.f32 %v4213_v12, %v1932_v18  ;;  %v1915_v24 = vmul.f32 %v4208_v42, %v1749_v47  ;;  %v1173_v49 = vpop.permute.xlu1 %1172 }
 0x25c   : > { %v1955_v23 = vadd.f32 %v4213_v12, %v1916_v16  ;;  %v1970_v8 = vadd.f32 %v4213_v12, %v1931_v35  ;;  %v1141_v46 = vpop.permute.xlu0 %1140  ;;  %v1540_v60 = vsel %vm1511_vm9, %v1507_v34, %v1173_v49 }
 0x25d   : > { %v2003_v22 = vmax.f32 %v1971_v7, 0.0  ;;  %v1954_v50 = vadd.f32 %v4213_v12, %v1915_v24  ;;  %v1524_v25 = vsel %vm1511_vm9, %v1491_v62, %v1141_v46 }
 0x25e   : > { %v1987_v15 = vmax.f32 %v1955_v23, 0.0  ;;  %v2002_v28 = vmax.f32 %v1970_v8, 0.0 }
 0x25f   : > { %2035 = vst [vmem:[%s4225_s24 + $0x88] sm:$0xff] %v2003_v22  ;;  %v1986_v31 = vmax.f32 %v1954_v50, 0.0  ;;  %v4228_v0 = vpop.permute.xlu1 %875  ;;  %v4682_v50 = vld [vmem:[#allocation26_spill] sm:$0xff] }
 0x260   : > { %2019 = vst [vmem:[%s4225_s24 + $0x8] sm:$0xff] %v1987_v15  ;;  %2034 = vst [vmem:[%s4225_s24 + $0x80] sm:$0xff] %v2002_v28  ;;  %v4232_v51 = vpop.permute.xlu0 %843  ;;  %v1443_v15 = vsel %vm1412_vm6, %v4682_v50, %v4228_v0  ;;  %v4684_v0 = vld [vmem:[#allocation64_spill] sm:$0xff] }
 0x261   : > { %2018 = vst [vmem:[%s4225_s24] sm:$0xff] %v1986_v31  ;;  %v4683_v31 = vld [vmem:[#allocation18_spill] sm:$0xff] }
 0x263   : > { %v1175_v37 = vpop.permute.xlu1 %1174 }
 0x264   : > { %v1143_v58 = vpop.permute.xlu0 %1142  ;;  %v1541_v36 = vsel %vm1511_vm9, %v1508_v5, %v1175_v37  ;;  %v1427_v37 = vsel %vm1412_vm6, %v4683_v31, %v4232_v51 }
 0x265   : > { %v1525_v19 = vsel %vm1511_vm9, %v1492_v10, %v1143_v58 }
 0x267   : > { %v1274_v39 = vpop.permute.xlu1 %1273 }
 0x268   : > { %v1573_v40 = vsel %vm1544_vm10, %v1540_v60, %v1274_v39  ;;  %v1242_v27 = vpop.permute.xlu0 %1241 }
 0x269   : > { %v1557_v43 = vsel %vm1544_vm10, %v1524_v25, %v1242_v27  ;;  %2316 = vmatprep.mubr.msk.f32.mxu1 %vm1582_vm11, %v1573_v40  ;;  %v4685_v25 = vld [vmem:[#allocation19_spill] sm:$0xff] }
 0x26a   : > { %2292 = vmatprep.mubr.msk.f32.mxu0 %vm1582_vm11, %v1557_v43 }
 0x26b   : > { %v878_v44 = vpop.permute.xlu1 %877 }
 0x26c   : > { %v846_v14 = vpop.permute.xlu0 %845  ;;  %v1444_v62 = vsel %vm1412_vm6, %v4684_v0, %v878_v44 }
 0x26d   : > { %v1428_v40 = vsel %vm1412_vm6, %v4685_v25, %v846_v14 }
 0x26f   : > { %v977_v61 = vpop.permute.xlu1 %976 }
 0x270   : > { %v945_v21 = vpop.permute.xlu0 %944  ;;  %v1476_v3 = vsel %vm1445_vm7, %v1443_v15, %v977_v61 }
 0x271   : > { %v1460_v58 = vsel %vm1445_vm7, %v1427_v37, %v945_v21 }
 0x273   : > { %v1276_v20 = vpop.permute.xlu1 %1275 }
 0x274   : > { %v1574_v30 = vsel %vm1544_vm10, %v1541_v36, %v1276_v20  ;;  %v1244_v55 = vpop.permute.xlu0 %1243 }
 0x275   : > { %v1558_v48 = vsel %vm1544_vm10, %v1525_v19, %v1244_v55  ;;  %2317 = vmatmul.mubr.msk.f32.gmra.mrb[12].mxu1 %vm1582_vm11, %v1574_v30 }
 0x276   : > { %2293 = vmatmul.mubr.msk.f32.gmra.mrb[12].mxu0 %vm1582_vm11, %v1558_v48 }
 0x277   : > { %v979_v4 = vpop.permute.xlu1 %978 }
 0x278   : > { %v947_v59 = vpop.permute.xlu0 %946  ;;  %v1477_v27 = vsel %vm1445_vm7, %v1444_v62, %v979_v4 }
 0x279   : > { %v1461_v61 = vsel %vm1445_vm7, %v1428_v40, %v947_v59 }
 0x27b   : > { %v1075_v32 = vpop.permute.xlu1 %1074 }
 0x27c   : > { %v1043_v9 = vpop.permute.xlu0 %1042  ;;  %v1509_v29 = vsel %vm1478_vm8, %v1476_v3, %v1075_v32 }
 0x27d   : > { %v1493_v45 = vsel %vm1478_vm8, %v1460_v58, %v1043_v9 }
 0x27f   : > { %v1077_v41 = vpop.permute.xlu1 %1076 }
 0x280   : > { %v1045_v13 = vpop.permute.xlu0 %1044  ;;  %v2303_v63 = vpop.f32.mrb[2].mxu1  ;;  %v1510_v52 = vsel %vm1478_vm8, %v1477_v27, %v1077_v41 }
 0x281   : > { %v2279_v11 = vpop.f32.mrb[2].mxu0  ;;  %v1934_v26 = vmul.f32 %v2303_v63, %v4208_v42  ;;  %v1839_v38 = vpop.f32.mrb[3].mxu1  ;;  %v1494_v44 = vsel %vm1478_vm8, %v1461_v61, %v1045_v13 }
 0x282   : > { %v1918_v56 = vmul.f32 %v2279_v11, %v4208_v42  ;;  %v1759_v1 = vpop.f32.mrb[3].mxu0  ;;  %v1933_v53 = vmul.f32 %v4208_v42, %v1839_v38 }
 0x283   : > { %v1973_v18 = vadd.f32 %v4213_v12, %v1934_v26  ;;  %v1917_v57 = vmul.f32 %v4208_v42, %v1759_v1  ;;  %v1177_v16 = vpop.permute.xlu1 %1176 }
 0x284   : > { %v1957_v47 = vadd.f32 %v4213_v12, %v1918_v56  ;;  %v1972_v35 = vadd.f32 %v4213_v12, %v1933_v53  ;;  %v1145_v7 = vpop.permute.xlu0 %1144  ;;  %v1542_v54 = vsel %vm1511_vm9, %v1509_v29, %v1177_v16 }
 0x285   : > { %v2005_v24 = vmax.f32 %v1973_v18, 0.0  ;;  %v1956_v49 = vadd.f32 %v4213_v12, %v1917_v57  ;;  %v1526_v60 = vsel %vm1511_vm9, %v1493_v45, %v1145_v7 }
 0x286   : > { %v1989_v23 = vmax.f32 %v1957_v47, 0.0  ;;  %v2004_v8 = vmax.f32 %v1972_v35, 0.0 }
 0x287   : > { %2037 = vst [vmem:[%s4225_s24 + $0x98] sm:$0xff] %v2005_v24  ;;  %v1988_v46 = vmax.f32 %v1956_v49, 0.0  ;;  %v1179_v22 = vpop.permute.xlu1 %1178 }
 0x288   : > { %2021 = vst [vmem:[%s4225_s24 + $0x18] sm:$0xff] %v1989_v23  ;;  %2036 = vst [vmem:[%s4225_s24 + $0x90] sm:$0xff] %v2004_v8  ;;  %v1147_v28 = vpop.permute.xlu0 %1146  ;;  %v1543_v21 = vsel %vm1511_vm9, %v1510_v52, %v1179_v22 }
 0x289   : > { %2020 = vst [vmem:[%s4225_s24 + $0x10] sm:$0xff] %v1988_v46  ;;  %v1527_v33 = vsel %vm1511_vm9, %v1494_v44, %v1147_v28 }
 0x28b   : > { %v1278_v34 = vpop.permute.xlu1 %1277 }
 0x28c   : > { %v1575_v39 = vsel %vm1544_vm10, %v1542_v54, %v1278_v34  ;;  %v1246_v51 = vpop.permute.xlu0 %1245 }
 0x28d   : > { %v1559_v43 = vsel %vm1544_vm10, %v1526_v60, %v1246_v51  ;;  %2319 = vmatprep.mubr.msk.f32.mxu1 %vm1582_vm11, %v1575_v39 }
 0x28e   : > { %2295 = vmatprep.mubr.msk.f32.mxu0 %vm1582_vm11, %v1559_v43 }
 0x28f   : > { %v1280_v17 = vpop.permute.xlu1 %1279 }
 0x290   : > { %v1576_v14 = vsel %vm1544_vm10, %v1543_v21, %v1280_v17  ;;  %v1248_v2 = vpop.permute.xlu0 %1247 }
 0x291   : > { %v1560_v6 = vsel %vm1544_vm10, %v1527_v33, %v1248_v2  ;;  %2320 = vmatmul.mubr.msk.f32.gmra.mrb[14].mxu1 %vm1582_vm11, %v1576_v14 }
 0x292   : > { %2296 = vmatmul.mubr.msk.f32.gmra.mrb[14].mxu0 %vm1582_vm11, %v1560_v6 }
 0x2a8   : > { %v2306_v5 = vpop.f32.mrb[4].mxu1 }
 0x2a9   : > { %v2282_v10 = vpop.f32.mrb[4].mxu0  ;;  %v1936_v36 = vmul.f32 %v2306_v5, %v4208_v42  ;;  %v1849_v20 = vpop.f32.mrb[5].mxu1 }
 0x2aa   : > { %v1920_v19 = vmul.f32 %v2282_v10, %v4208_v42  ;;  %v1769_v30 = vpop.f32.mrb[5].mxu0  ;;  %v1935_v55 = vmul.f32 %v4208_v42, %v1849_v20 }
 0x2ab   : > { %v1975_v48 = vadd.f32 %v4213_v12, %v1936_v36  ;;  %v1919_v4 = vmul.f32 %v4208_v42, %v1769_v30 }
 0x2ac   : > { %v1959_v59 = vadd.f32 %v4213_v12, %v1920_v19  ;;  %v1974_v32 = vadd.f32 %v4213_v12, %v1935_v55 }
 0x2ad   : > { %v2007_v9 = vmax.f32 %v1975_v48, 0.0  ;;  %v1958_v41 = vadd.f32 %v4213_v12, %v1919_v4 }
 0x2ae   : > { %v1991_v13 = vmax.f32 %v1959_v59, 0.0  ;;  %v2006_v63 = vmax.f32 %v1974_v32, 0.0 }
 0x2af   : > { %2039 = vst [vmem:[%s4225_s24 + $0xa8] sm:$0xff] %v2007_v9  ;;  %v1990_v11 = vmax.f32 %v1958_v41, 0.0 }
 0x2b0   : > { %2023 = vst [vmem:[%s4225_s24 + $0x28] sm:$0xff] %v1991_v13  ;;  %2038 = vst [vmem:[%s4225_s24 + $0xa0] sm:$0xff] %v2006_v63 }
 0x2b1   : > { %2022 = vst [vmem:[%s4225_s24 + $0x20] sm:$0xff] %v1990_v11 }
 0x2d0   : > { %v2309_v26 = vpop.f32.mrb[6].mxu1 }
 0x2d1   : > { %v2285_v38 = vpop.f32.mrb[6].mxu0  ;;  %v1938_v56 = vmul.f32 %v2309_v26, %v4208_v42  ;;  %v1859_v1 = vpop.f32.mrb[7].mxu1 }
 0x2d2   : > { %v1922_v53 = vmul.f32 %v2285_v38, %v4208_v42  ;;  %v1779_v18 = vpop.f32.mrb[7].mxu0  ;;  %v1937_v57 = vmul.f32 %v4208_v42, %v1859_v1 }
 0x2d3   : > { %v1977_v16 = vadd.f32 %v4213_v12, %v1938_v56  ;;  %v1921_v47 = vmul.f32 %v4208_v42, %v1779_v18 }
 0x2d4   : > { %v1961_v35 = vadd.f32 %v4213_v12, %v1922_v53  ;;  %v1976_v7 = vadd.f32 %v4213_v12, %v1937_v57 }
 0x2d5   : > { %v2009_v24 = vmax.f32 %v1977_v16, 0.0  ;;  %v1960_v49 = vadd.f32 %v4213_v12, %v1921_v47 }
 0x2d6   : > { %v1993_v23 = vmax.f32 %v1961_v35, 0.0  ;;  %v2008_v8 = vmax.f32 %v1976_v7, 0.0 }
 0x2d7   : > { %2041 = vst [vmem:[%s4225_s24 + $0xb8] sm:$0xff] %v2009_v24  ;;  %v1992_v46 = vmax.f32 %v1960_v49, 0.0 }
 0x2d8   : > { %2025 = vst [vmem:[%s4225_s24 + $0x38] sm:$0xff] %v1993_v23  ;;  %2040 = vst [vmem:[%s4225_s24 + $0xb0] sm:$0xff] %v2008_v8 }
 0x2d9   : > { %2024 = vst [vmem:[%s4225_s24 + $0x30] sm:$0xff] %v1992_v46 }
 0x2f8   : > { %v2312_v22 = vpop.f32.mrb[8].mxu1 }
 0x2f9   : > { %v2288_v50 = vpop.f32.mrb[8].mxu0  ;;  %v1940_v15 = vmul.f32 %v2312_v22, %v4208_v42  ;;  %v1869_v28 = vpop.f32.mrb[9].mxu1 }
 0x2fa   : > { %v1924_v31 = vmul.f32 %v2288_v50, %v4208_v42  ;;  %v1789_v37 = vpop.f32.mrb[9].mxu0  ;;  %v1939_v3 = vmul.f32 %v4208_v42, %v1869_v28 }
 0x2fb   : > { %v1979_v58 = vadd.f32 %v4213_v12, %v1940_v15  ;;  %v1923_v29 = vmul.f32 %v4208_v42, %v1789_v37 }
 0x2fc   : > { %v1963_v45 = vadd.f32 %v4213_v12, %v1924_v31  ;;  %v1978_v54 = vadd.f32 %v4213_v12, %v1939_v3 }
 0x2fd   : > { %v2011_v34 = vmax.f32 %v1979_v58, 0.0  ;;  %v1962_v0 = vadd.f32 %v4213_v12, %v1923_v29 }
 0x2fe   : > { %v1995_v62 = vmax.f32 %v1963_v45, 0.0  ;;  %v2010_v60 = vmax.f32 %v1978_v54, 0.0 }
 0x2ff   : > { %2043 = vst [vmem:[%s4225_s24 + $0xc8] sm:$0xff] %v2011_v34  ;;  %v1994_v39 = vmax.f32 %v1962_v0, 0.0 }
 0x300   : > { %2027 = vst [vmem:[%s4225_s24 + $0x48] sm:$0xff] %v1995_v62  ;;  %2042 = vst [vmem:[%s4225_s24 + $0xc0] sm:$0xff] %v2010_v60 }
 0x301   : > { %2026 = vst [vmem:[%s4225_s24 + $0x40] sm:$0xff] %v1994_v39 }
 0x320   : > { %v2315_v51 = vpop.f32.mrb[10].mxu1 }
 0x321   : > { %v2291_v25 = vpop.f32.mrb[10].mxu0  ;;  %v1942_v40 = vmul.f32 %v2315_v51, %v4208_v42  ;;  %v1879_v27 = vpop.f32.mrb[11].mxu1 }
 0x322   : > { %v1926_v43 = vmul.f32 %v2291_v25, %v4208_v42  ;;  %v1799_v61 = vpop.f32.mrb[11].mxu0  ;;  %v1941_v52 = vmul.f32 %v4208_v42, %v1879_v27 }
 0x323   : > { %v1981_v44 = vadd.f32 %v4213_v12, %v1942_v40  ;;  %v1925_v21 = vmul.f32 %v4208_v42, %v1799_v61 }
 0x324   : > { %v1965_v17 = vadd.f32 %v4213_v12, %v1926_v43  ;;  %v1980_v33 = vadd.f32 %v4213_v12, %v1941_v52 }
 0x325   : > { %v2013_v14 = vmax.f32 %v1981_v44, 0.0  ;;  %v1964_v2 = vadd.f32 %v4213_v12, %v1925_v21 }
 0x326   : > { %v1997_v6 = vmax.f32 %v1965_v17, 0.0  ;;  %v2012_v5 = vmax.f32 %v1980_v33, 0.0 }
 0x327   : > { %2045 = vst [vmem:[%s4225_s24 + $0xd8] sm:$0xff] %v2013_v14  ;;  %v1996_v10 = vmax.f32 %v1964_v2, 0.0 }
 0x328   : > { %2029 = vst [vmem:[%s4225_s24 + $0x58] sm:$0xff] %v1997_v6  ;;  %2044 = vst [vmem:[%s4225_s24 + $0xd0] sm:$0xff] %v2012_v5 }
 0x329   : > { %2028 = vst [vmem:[%s4225_s24 + $0x50] sm:$0xff] %v1996_v10 }
 0x348   : > { %v2318_v36 = vpop.f32.mrb[12].mxu1 }
 0x349   : > { %v2294_v20 = vpop.f32.mrb[12].mxu0  ;;  %v1944_v19 = vmul.f32 %v2318_v36, %v4208_v42  ;;  %v1889_v30 = vpop.f32.mrb[13].mxu1 }
 0x34a   : > { %v1928_v55 = vmul.f32 %v2294_v20, %v4208_v42  ;;  %v1809_v48 = vpop.f32.mrb[13].mxu0  ;;  %v1943_v4 = vmul.f32 %v4208_v42, %v1889_v30 }
 0x34b   : > { %v1983_v59 = vadd.f32 %v4213_v12, %v1944_v19  ;;  %v1927_v32 = vmul.f32 %v4208_v42, %v1809_v48 }
 0x34c   : > { %v1967_v9 = vadd.f32 %v4213_v12, %v1928_v55  ;;  %v1982_v41 = vadd.f32 %v4213_v12, %v1943_v4 }
 0x34d   : > { %v2015_v13 = vmax.f32 %v1983_v59, 0.0  ;;  %v1966_v63 = vadd.f32 %v4213_v12, %v1927_v32 }
 0x34e   : > { %v1999_v11 = vmax.f32 %v1967_v9, 0.0  ;;  %v2014_v26 = vmax.f32 %v1982_v41, 0.0 }
 0x34f   : > { %2047 = vst [vmem:[%s4225_s24 + $0xe8] sm:$0xff] %v2015_v13  ;;  %v1998_v38 = vmax.f32 %v1966_v63, 0.0 }
 0x350   : > { %2031 = vst [vmem:[%s4225_s24 + $0x68] sm:$0xff] %v1999_v11  ;;  %2046 = vst [vmem:[%s4225_s24 + $0xe0] sm:$0xff] %v2014_v26 }
 0x351   : > { %2030 = vst [vmem:[%s4225_s24 + $0x60] sm:$0xff] %v1998_v38 }
 0x364   : > { %v2321_v56 = vpop.f32.mrb[14].mxu1 }
 0x365   : > { %v2297_v1 = vpop.f32.mrb[14].mxu0  ;;  %v1946_v53 = vmul.f32 %v2321_v56, %v4208_v42  ;;  %v1899_v18 = vpop.f32.mrb[15].mxu1 }
 0x366   : > { %v1930_v57 = vmul.f32 %v2297_v1, %v4208_v42  ;;  %v1819_v16 = vpop.f32.mrb[15].mxu0  ;;  %v1945_v47 = vmul.f32 %v4208_v42, %v1899_v18 }
 0x367   : > { %v1985_v35 = vadd.f32 %v4213_v12, %v1946_v53  ;;  %v1929_v7 = vmul.f32 %v4208_v42, %v1819_v16 }
 0x368   : > { %v1969_v24 = vadd.f32 %v4213_v12, %v1930_v57  ;;  %v1984_v49 = vadd.f32 %v4213_v12, %v1945_v47 }
 0x369   : > { %v2017_v23 = vmax.f32 %v1985_v35, 0.0  ;;  %v1968_v8 = vadd.f32 %v4213_v12, %v1929_v7 }
 0x36a   : > { %v2001_v46 = vmax.f32 %v1969_v24, 0.0  ;;  %v2016_v22 = vmax.f32 %v1984_v49, 0.0 }
 0x36b   : > { %2049 = vst [vmem:[%s4225_s24 + $0xf8] sm:$0xff] %v2017_v23  ;;  %v2000_v42 = vmax.f32 %v1968_v8, 0.0 }
 0x36c   : > { %2033 = vst [vmem:[%s4225_s24 + $0x78] sm:$0xff] %v2001_v46  ;;  %2048 = vst [vmem:[%s4225_s24 + $0xf0] sm:$0xff] %v2016_v22 }
 0x36d   : > { %2032 = vst [vmem:[%s4225_s24 + $0x70] sm:$0xff] %v2000_v42 }
 0x36e   : > { %2432 = shalt.err (!%p2429_p5)
}
 0x36f   : > { %s2433_s7 = scalar_lea.hbm %s4382_s6, 4096  ;;  %s2437_s21 = scalar_lea.hbm %s4443_s4, 8192 }
 0x370   : > { %p2434_p6 = scmp.ne.s32.totalorder %s4382_s6, %s2433_s7  ;;  %p2438_p10 = scmp.lt.u32.totalorder %s4382_s6, %s4443_s4 }
 0x371   : > { %p2439_p11 = scmp.lt.u32.totalorder %s2437_s21, %s2433_s7  ;;  %p2441_p13 = scmp.lt.u32.totalorder %s2433_s7, %s4382_s6 }
 0x372   : > { %p2435_p7 = pnand %p2434_p6, %p2574_p4 }
 0x373   : > { %p2440_p12 = por %p2439_p11, %p2438_p10 }
 0x374   : > { %p2436_p9 = pneg %p2435_p7 }
 0x375   : > { %p2442_p0 = por %p2441_p13, %p2440_p12 }
 0x377   : > { %p2443_p1 = pnand %p2442_p0, %p2436_p9 }
 0x379   : > { %2446 = shalt.err (!%p2443_p1)
}
 0x37a   : > { %s2508_s26 = smov 128  }
 0x37b   : > { %2337 = dma.vmem_to_hbm [thread:$0]  (%p2574_p4), %s4385_s29, 4096, %s4382_s6, %s4392_s18, %s2508_s26, %s2508_s26, %s2500_s9  }
 0x37c PF: > { %p2343_p2 = scmp.ge.s32.totalorder %s2497_s20, 2  ;;  %s2080_s30 = sand.u32 1, %s2477_s15  }
 0x37d   : > { %s2081_s5 = scalar_lea.sflag [#allocation3], %s2080_s30 }
 0x37e   : > { %p2340_p3 = pnand %p2343_p2, %p2581_p8 }
 0x380   : > { %2472 = dma.done.wait (!%p2340_p3), %s2081_s5, 4096  }
 0x381   : > { %2474 = vsyncadd (!%p2340_p3), %s2081_s5, 4294963200  ;;  %s17_s20 = sadd.s32 1, %s2497_s20   ;;  %s4686_s15 = smov %s2481_s16 }
 0x382   : > { %p14_p5 = scmp.ge.s32.totalorder %s17_s20, 4   ;;  %s4687_s16 = smov %s2485_s17 }
 0x383   : > { %s4688_s17 = smov %s2587_s28  ;;  %s4689_s18 = smov %s2493_s19 }
 0x384   : > { %s4690_s19 = smov %s4692_s23  ;;  %16 = sbr.rel (!%p14_p5) target bundleno = 4 (0x4), region = 80 }
 0x38b   :  { %2086 = vsyncpa [#allocation3], 1 }
 0x38c   :  { %2088 = vsyncpa [#allocation3 + $0x1], 1 }

</bundles_post_ra>
